<compile_context>
chip_gen: v6e
topology: v6e:2x2x1
jax: 0.10.0
libtpu: 0.0.40
codegen_flags: <defaults>
</compile_context>

<pallas_src>
import functools

import jax
import jax.numpy as jnp
from jax import lax
from jax.experimental import pallas as pl
from jax.experimental.pallas import tpu as pltpu


# ---------------------------------------------------------------------------
# VMEM sizing helpers (re-derived per chip generation: v7x has half the VMEM)
# ---------------------------------------------------------------------------
def _vmem_caps():
    """Returns (streaming budget bytes, scoped vmem_limit_bytes)."""
    cap = 64 * 1024 * 1024  # conservative default = v7x physical VMEM per core
    try:
        cap = int(pltpu.get_tpu_info().vmem_capacity_bytes)
    except Exception:
        pass
    return cap // 4, cap // 2


def _round_up(n, m):
    return ((n + m - 1) // m) * m


def _choose_time_chunk(T, Bp, d_in, H, P, act_bytes, budget):
    """Largest divisor Tt of T whose streamed VMEM state fits `budget` bytes.

    Counts resident weights (both directions), double-buffered input + output
    chunks, the per-chunk f32 gate scratch and the (h, c) carry.
    """
    weights = 2 * (P * d_in + H) * 4 * H * act_bytes + 2 * 4 * H * 4
    state = 2 * Bp * H * 4
    best = 1
    for tt in range(1, T + 1):
        if T % tt:
            continue
        stream = 2 * tt * Bp * (P * d_in + H) * act_bytes   # double-buffered in + out
        gates = tt * Bp * 4 * H * 4
        if weights + state + stream + gates <= budget:
            best = tt
    return best


# ---------------------------------------------------------------------------
# Kernels
# ---------------------------------------------------------------------------
def _lstm_cell(g, c, H):
    """PyTorch-ordered (i, f, g, o) cell update from f32 pre-activations g (B, 4H)."""
    i = jax.nn.sigmoid(g[:, 0 * H:1 * H])
    f = jax.nn.sigmoid(g[:, 1 * H:2 * H])
    gg = jnp.tanh(g[:, 2 * H:3 * H])
    o = jax.nn.sigmoid(g[:, 3 * H:4 * H])
    c_new = f * c + i * gg
    h_new = o * jnp.tanh(c_new)
    return h_new, c_new


def _bilstm_layer_kernel(x_ref, wih_ref, whh_ref, b_ref, hseq_ref,
                         h_sc, c_sc, gx_sc, *, batch):
    """One bidirectional LSTM layer; one (direction, time-chunk) grid step.

    x_ref:    (P, Tt*B, D_in)  bf16  input chunk (P=1 raw input, P=2 fwd/bwd parts)
    wih_ref:  (P, D_in, 4H)    bf16  input weights of this direction (pre-transposed)
    whh_ref:  (H, 4H)          bf16  recurrent weights of this direction
    b_ref:    (1, 4H)          f32   b_ih + b_hh of this direction
    hseq_ref: (Tt*B, H)        bf16  per-timestep hidden output chunk
    h_sc/c_sc:(B, H)           f32   carried state (reset at the first chunk)
    gx_sc:    (Tt*B, 4H)       f32   hoisted input-projection scratch
    """
    d = pl.program_id(0)                 # 0 = forward, 1 = backward
    tc = pl.program_id(1)

    P, tb, _ = x_ref.shape
    H = whh_ref.shape[0]
    Tt = tb // batch

    @pl.when(tc == 0)
    def _init():
        h_sc[...] = jnp.zeros(h_sc.shape, h_sc.dtype)
        c_sc[...] = jnp.zeros(c_sc.shape, c_sc.dtype)

    # Hoisted input projection for the whole chunk: one MXU matmul per input part,
    # off the serial critical path.
    gx = jnp.dot(x_ref[0], wih_ref[0], preferred_element_type=jnp.float32)
    for p in range(1, P):
        gx = gx + jnp.dot(x_ref[p], wih_ref[p], preferred_element_type=jnp.float32)
    gx_sc[...] = gx + b_ref[...]

    w_hh = whh_ref[...]

    def step(s, carry):
        h, c = carry
        # forward walks the chunk front-to-back, backward back-to-front
        lt = (1 - d) * s + d * (Tt - 1 - s)
        ro = pl.multiple_of(lt * batch, batch)
        g = gx_sc[pl.ds(ro, batch)] + jnp.dot(
            h.astype(w_hh.dtype), w_hh, preferred_element_type=jnp.float32)
        h_new, c_new = _lstm_cell(g, c, H)
        hseq_ref[pl.ds(ro, batch)] = h_new.astype(hseq_ref.dtype)
        return h_new, c_new

    h, c = lax.fori_loop(0, Tt, step, (h_sc[...], c_sc[...]))
    h_sc[...] = h
    c_sc[...] = c


def _last_layer_head_kernel(x_ref, wih_ref, whh_ref, b_ref, wfc_ref, bfc_ref,
                            out_ref, h_sc, c_sc, gx_sc, *, batch):
    """Last bidirectional layer fused with dropout(identity)/sigmoid/FC head.

    Only lstm_out[:, -1, :] is consumed, so:
      * forward direction: full recurrence, but no per-timestep writeback,
      * backward direction: exactly one step on x[T-1] with zero state,
      * sigmoid + FC applied in-kernel at the last chunk.
    """
    tc = pl.program_id(0)
    n_chunks = pl.num_programs(0)

    P, tb, _ = x_ref.shape
    H = whh_ref.shape[1]
    Tt = tb // batch

    @pl.when(tc == 0)
    def _init():
        h_sc[...] = jnp.zeros(h_sc.shape, h_sc.dtype)
        c_sc[...] = jnp.zeros(c_sc.shape, c_sc.dtype)

    # forward direction: hoisted chunk projection + serial recurrence
    gx = jnp.dot(x_ref[0], wih_ref[0, 0], preferred_element_type=jnp.float32)
    for p in range(1, P):
        gx = gx + jnp.dot(x_ref[p], wih_ref[0, p], preferred_element_type=jnp.float32)
    gx_sc[...] = gx + b_ref[0]

    w_hh = whh_ref[0]

    def step(s, carry):
        h, c = carry
        ro = pl.multiple_of(s * batch, batch)
        g = gx_sc[pl.ds(ro, batch)] + jnp.dot(
            h.astype(w_hh.dtype), w_hh, preferred_element_type=jnp.float32)
        return _lstm_cell(g, c, H)

    h_fwd, c_fwd = lax.fori_loop(0, Tt, step, (h_sc[...], c_sc[...]))
    h_sc[...] = h_fwd
    c_sc[...] = c_fwd

    @pl.when(tc == n_chunks - 1)
    def _finalize():
        # backward direction: single step on x[T-1], zero initial state
        lo = (Tt - 1) * batch
        gb = jnp.dot(x_ref[0, lo:lo + batch], wih_ref[1, 0],
                     preferred_element_type=jnp.float32)
        for p in range(1, P):
            gb = gb + jnp.dot(x_ref[p, lo:lo + batch], wih_ref[1, p],
                              preferred_element_type=jnp.float32)
        g = gb + b_ref[1]
        i = jax.nn.sigmoid(g[:, 0 * H:1 * H])
        gg = jnp.tanh(g[:, 2 * H:3 * H])
        o = jax.nn.sigmoid(g[:, 3 * H:4 * H])
        c_b = i * gg                           # f * c0 == 0
        h_bwd = o * jnp.tanh(c_b)

        # head: sigmoid(concat(h_fwd, h_bwd)) @ W_fc.T + b_fc, concat split by parts
        z_f = jax.nn.sigmoid(h_fwd)
        z_b = jax.nn.sigmoid(h_bwd)
        out = (jnp.dot(z_f, wfc_ref[0], preferred_element_type=jnp.float32)
               + jnp.dot(z_b, wfc_ref[1], preferred_element_type=jnp.float32)
               + bfc_ref[...])
        out_ref[...] = out.astype(out_ref.dtype)


# ---------------------------------------------------------------------------
# pallas_call wrappers
# ---------------------------------------------------------------------------
def _bilstm_layer(x, wih, whh, b, *, t_chunk, batch, vmem_limit):
    P, TB, d_in = x.shape
    H = whh.shape[1]
    n_chunks = TB // (t_chunk * batch)

    def rev(d, tc):          # forward: tc, backward: reversed chunk order
        return (1 - d) * tc + d * (n_chunks - 1 - tc)

    kernel = functools.partial(_bilstm_layer_kernel, batch=batch)
    return pl.pallas_call(
        kernel,
        out_shape=jax.ShapeDtypeStruct((2, TB, H), x.dtype),
        grid_spec=pltpu.PrefetchScalarGridSpec(
            num_scalar_prefetch=0,
            grid=(2, n_chunks),
            in_specs=[
                pl.BlockSpec((P, t_chunk * batch, d_in),
                             lambda d, tc: (0, rev(d, tc), 0)),
                pl.BlockSpec((None, P, d_in, 4 * H), lambda d, tc: (d, 0, 0, 0)),
                pl.BlockSpec((None, H, 4 * H), lambda d, tc: (d, 0, 0)),
                pl.BlockSpec((None, 1, 4 * H), lambda d, tc: (d, 0, 0)),
            ],
            out_specs=pl.BlockSpec((None, t_chunk * batch, H),
                                   lambda d, tc: (d, rev(d, tc), 0)),
            scratch_shapes=[
                pltpu.VMEM((batch, H), jnp.float32),
                pltpu.VMEM((batch, H), jnp.float32),
                pltpu.VMEM((t_chunk * batch, 4 * H), jnp.float32),
            ]),
        compiler_params=pltpu.CompilerParams(
            dimension_semantics=("parallel", "arbitrary"),   # fwd/bwd -> 2 TCs on v7x
            vmem_limit_bytes=vmem_limit),
    )(x, wih, whh, b)


def _last_layer_head(x, wih, whh, b, wfc, bfc, *, t_chunk, batch, vmem_limit):
    P, TB, d_in = x.shape
    H = whh.shape[1]
    C = wfc.shape[2]
    n_chunks = TB // (t_chunk * batch)
    kernel = functools.partial(_last_layer_head_kernel, batch=batch)
    return pl.pallas_call(
        kernel,
        out_shape=jax.ShapeDtypeStruct((batch, C), jnp.float32),
        grid_spec=pltpu.PrefetchScalarGridSpec(
            num_scalar_prefetch=0,
            grid=(n_chunks,),
            in_specs=[
                pl.BlockSpec((P, t_chunk * batch, d_in), lambda tc: (0, tc, 0)),
                pl.BlockSpec((2, P, d_in, 4 * H), lambda tc: (0, 0, 0, 0)),
                pl.BlockSpec((2, H, 4 * H), lambda tc: (0, 0, 0)),
                pl.BlockSpec((2, 1, 4 * H), lambda tc: (0, 0, 0)),
                pl.BlockSpec((2, H, C), lambda tc: (0, 0, 0)),
                pl.BlockSpec((1, C), lambda tc: (0, 0)),
            ],
            out_specs=pl.BlockSpec((batch, C), lambda tc: (0, 0)),
            scratch_shapes=[
                pltpu.VMEM((batch, H), jnp.float32),
                pltpu.VMEM((batch, H), jnp.float32),
                pltpu.VMEM((t_chunk * batch, 4 * H), jnp.float32),
            ]),
        compiler_params=pltpu.CompilerParams(
            dimension_semantics=("arbitrary",),
            vmem_limit_bytes=vmem_limit),
    )(x, wih, whh, b, wfc, bfc)


# ---------------------------------------------------------------------------
# Forward pass (matches LSTMClassifier.forward in eval mode)
# ---------------------------------------------------------------------------
@jax.jit
def lstm_classifier_forward(x, params):
    """x: (B, T, vocab_size) f32 -> logits (B, num_classes) f32."""
    # TODO(synk): train-mode dropout (p=0.5) RNG masking is not implemented;
    #             this is eval-mode inference where all dropouts are identity.
    B, T, D = x.shape
    layers = params["lstm"]
    act_dtype = layers[0]["wih"].dtype
    act_bytes = jnp.dtype(act_dtype).itemsize
    budget, vmem_limit = _vmem_caps()

    # pad batch to a dense sublane multiple (16 rows for bf16, 8 for f32)
    sub = max(8, 32 // act_bytes)
    Bp = _round_up(B, sub)
    xp = jnp.pad(x, ((0, Bp - B), (0, 0), (0, 0))).astype(act_dtype)

    # time-major, flattened (parts=1, T*B, D) layout for the first layer
    h = jnp.transpose(xp, (1, 0, 2)).reshape(1, T * Bp, D)

    # all layers but the last: full (2, T*B, H) bidirectional sequence output
    for lp in layers[:-1]:
        P, d_in = lp["wih"].shape[1], lp["wih"].shape[2]
        H = lp["whh"].shape[1]
        tt = _choose_time_chunk(T, Bp, d_in, H, P, act_bytes, budget)
        h = _bilstm_layer(h, lp["wih"], lp["whh"], lp["b"],
                          t_chunk=tt, batch=Bp, vmem_limit=vmem_limit)
        # nn.LSTM inter-layer dropout(0.5) is identity in eval mode.

    # last layer specialized + fused with sigmoid(last step) + fc head
    lp = layers[-1]
    P, d_in = lp["wih"].shape[1], lp["wih"].shape[2]
    H = lp["whh"].shape[1]
    tt = _choose_time_chunk(T, Bp, d_in, H, P, act_bytes, budget)
    out = _last_layer_head(h, lp["wih"], lp["whh"], lp["b"],
                           params["fc_w"], params["fc_b"],
                           t_chunk=tt, batch=Bp, vmem_limit=vmem_limit)
    return out[:B]


# ---------------------------------------------------------------------------
# Deterministic parameter construction (PyTorch-style uniform(-1/sqrt(H), 1/sqrt(H)))
# ---------------------------------------------------------------------------
def make_params(key, vocab_size, hidden_dim, num_layers, num_classes,
                compute_dtype=jnp.bfloat16):
    """Per layer: wih (2, P, D_in/P, 4H), whh (2, H, 4H) in compute_dtype,
    b = b_ih + b_hh (2, 1, 4H) f32.  fc: W.T as (2, H, C), b as (1, C), f32."""
    H = hidden_dim
    k = 1.0 / float(H) ** 0.5

    def uni(kk, shape, scale):
        return jax.random.uniform(kk, shape, jnp.float32, -scale, scale)

    keys = iter(jax.random.split(key, num_layers * 2 * 4 + 2))
    layers = []
    for layer in range(num_layers):
        d_in = vocab_size if layer == 0 else 2 * H
        P = 1 if layer == 0 else 2
        wih_d, whh_d, b_d = [], [], []
        for _ in range(2):                                    # forward, backward
            w_ih = uni(next(keys), (4 * H, d_in), k)          # PyTorch weight_ih_l{l}[_reverse]
            w_hh = uni(next(keys), (4 * H, H), k)             # PyTorch weight_hh_l{l}[_reverse]
            b_ih = uni(next(keys), (4 * H,), k)
            b_hh = uni(next(keys), (4 * H,), k)
            wih_d.append(w_ih.T.reshape(P, d_in // P, 4 * H))
            whh_d.append(w_hh.T)
            b_d.append((b_ih + b_hh)[None, :])
        layers.append({
            "wih": jnp.stack(wih_d).astype(compute_dtype),    # (2, P, D_in/P, 4H)
            "whh": jnp.stack(whh_d).astype(compute_dtype),    # (2, H, 4H)
            "b": jnp.stack(b_d),                              # (2, 1, 4H) f32
        })

    k_fc = 1.0 / float(2 * H) ** 0.5
    fc_w = uni(next(keys), (num_classes, 2 * H), k_fc)
    fc_b = uni(next(keys), (num_classes,), k_fc)
    return {"lstm": layers,
            "fc_w": fc_w.T.reshape(2, H, num_classes),        # (2, H, C) f32
            "fc_b": fc_b[None, :]}                            # (1, C)   f32


# ---------------------------------------------------------------------------
if __name__ == "__main__":
    vocab_size = 16
    hidden_dim = 32
    num_layers = 2
    num_classes = 2
    batch, seq = 2, 8

    root = jax.random.PRNGKey(0)
    k_x, k_p = jax.random.split(root)
    x = jax.random.normal(k_x, (batch, seq, vocab_size), jnp.float32)
    params = make_params(k_p, vocab_size, hidden_dim, num_layers, num_classes)

    out = lstm_classifier_forward(x, params)
    jax.block_until_ready(out)
    assert out.shape == (batch, num_classes)
    print("KERNEL_OK")
</pallas_src>

<mosaic_0001>
module attributes {stable_mosaic.version = 11 : i64} {
  func.func @_bilstm_layer_kernel(%arg0: i32, %arg1: i32, %arg2: memref<1x128x16xbf16, #tpu.memory_space<vmem>>, %arg3: memref<1x1x16x128xbf16, #tpu.memory_space<vmem>>, %arg4: memref<1x32x128xbf16, #tpu.memory_space<vmem>>, %arg5: memref<1x1x128xf32, #tpu.memory_space<vmem>>, %arg6: memref<1x128x32xbf16, #tpu.memory_space<vmem>>, %arg7: memref<16x32xf32, #tpu.memory_space<vmem>>, %arg8: memref<16x32xf32, #tpu.memory_space<vmem>>, %arg9: memref<128x128xf32, #tpu.memory_space<vmem>>) attributes {dimension_semantics = [#tpu.dimension_semantics<parallel>, #tpu.dimension_semantics<arbitrary>], iteration_bounds = array<i64: 2, 1>, scalar_prefetch = 0 : i64, scratch_operands = 3 : i64, tpu.core_type = #tpu.core_type<tc>, window_params = [{transform_indices = @transform_0, window_bounds = array<i64: 1, 128, 16>}, {transform_indices = @transform_1, window_bounds = array<i64: 1, 1, 16, 128>}, {transform_indices = @transform_2, window_bounds = array<i64: 1, 32, 128>}, {transform_indices = @transform_3, window_bounds = array<i64: 1, 1, 128>}, {transform_indices = @transform_4, window_bounds = array<i64: 1, 128, 32>}]} {
    %c0_i32 = arith.constant 0 : i32
    %0 = arith.cmpi eq, %arg1, %c0_i32 : i32
    %1 = arith.extui %0 : i1 to i32
    %c0_i32_0 = arith.constant 0 : i32
    %2 = arith.cmpi ne, %1, %c0_i32_0 : i32
    scf.if %2 {
      %cst_25 = arith.constant 0.000000e+00 : f32
      %21 = vector.broadcast %cst_25 : f32 to vector<16x32xf32>
      %c0_26 = arith.constant 0 : index
      %c0_27 = arith.constant 0 : index
      %22 = vector.load %arg7[%c0_26, %c0_27] : memref<16x32xf32, #tpu.memory_space<vmem>>, vector<16x32xf32>
      tpu.vector_store %arg7[%c0_26, %c0_27], %21 {strides = array<i32>} : memref<16x32xf32, #tpu.memory_space<vmem>>, vector<16x32xf32>,
      %cst_28 = arith.constant 0.000000e+00 : f32
      %23 = vector.broadcast %cst_28 : f32 to vector<16x32xf32>
      %c0_29 = arith.constant 0 : index
      %c0_30 = arith.constant 0 : index
      %24 = vector.load %arg8[%c0_29, %c0_30] : memref<16x32xf32, #tpu.memory_space<vmem>>, vector<16x32xf32>
      tpu.vector_store %arg8[%c0_29, %c0_30], %23 {strides = array<i32>} : memref<16x32xf32, #tpu.memory_space<vmem>>, vector<16x32xf32>,
    } else {
    }
    %c0 = arith.constant 0 : index
    %c0_1 = arith.constant 0 : index
    %c0_2 = arith.constant 0 : index
    %3 = vector.load %arg2[%c0, %c0_1, %c0_2] : memref<1x128x16xbf16, #tpu.memory_space<vmem>>, vector<1x128x16xbf16>
    %4 = vector.shape_cast %3 : vector<1x128x16xbf16> to vector<128x16xbf16>
    %c0_3 = arith.constant 0 : index
    %c0_4 = arith.constant 0 : index
    %c0_5 = arith.constant 0 : index
    %c0_6 = arith.constant 0 : index
    %5 = vector.load %arg3[%c0_3, %c0_4, %c0_5, %c0_6] : memref<1x1x16x128xbf16, #tpu.memory_space<vmem>>, vector<1x1x16x128xbf16>
    %6 = vector.shape_cast %5 : vector<1x1x16x128xbf16> to vector<16x128xbf16>
    %cst = arith.constant dense<0.000000e+00> : vector<128x128xf32>
    %7 = tpu.matmul %4, %6, %cst {dimension_numbers = #tpu.dot_dimension_numbers<[1], [0], [0], [1], [0, 0, 1, 1], [], []>} : vector<128x16xbf16>, vector<16x128xbf16>, vector<128x128xf32> -> vector<128x128xf32>
    %c0_7 = arith.constant 0 : index
    %c0_8 = arith.constant 0 : index
    %c0_9 = arith.constant 0 : index
    %8 = vector.load %arg5[%c0_7, %c0_8, %c0_9] : memref<1x1x128xf32, #tpu.memory_space<vmem>>, vector<1x1x128xf32>
    %9 = vector.shape_cast %8 : vector<1x1x128xf32> to vector<1x128xf32>
    %10 = vector.broadcast %9 : vector<1x128xf32> to vector<128x128xf32>
    %11 = arith.addf %7, %10 : vector<128x128xf32>
    %c0_10 = arith.constant 0 : index
    %c0_11 = arith.constant 0 : index
    %12 = vector.load %arg9[%c0_10, %c0_11] : memref<128x128xf32, #tpu.memory_space<vmem>>, vector<128x128xf32>
    tpu.vector_store %arg9[%c0_10, %c0_11], %11 {strides = array<i32>} : memref<128x128xf32, #tpu.memory_space<vmem>>, vector<128x128xf32>,
    %c0_12 = arith.constant 0 : index
    %c0_13 = arith.constant 0 : index
    %c0_14 = arith.constant 0 : index
    %13 = vector.load %arg4[%c0_12, %c0_13, %c0_14] : memref<1x32x128xbf16, #tpu.memory_space<vmem>>, vector<1x32x128xbf16>
    %14 = vector.shape_cast %13 : vector<1x32x128xbf16> to vector<32x128xbf16>
    %c0_15 = arith.constant 0 : index
    %c0_16 = arith.constant 0 : index
    %15 = vector.load %arg7[%c0_15, %c0_16] : memref<16x32xf32, #tpu.memory_space<vmem>>, vector<16x32xf32>
    %c0_17 = arith.constant 0 : index
    %c0_18 = arith.constant 0 : index
    %16 = vector.load %arg8[%c0_17, %c0_18] : memref<16x32xf32, #tpu.memory_space<vmem>>, vector<16x32xf32>
    %c0_i32_19 = arith.constant 0 : i32
    %c8_i32 = arith.constant 8 : i32
    %17 = arith.addi %c0_i32_19, %c8_i32 : i32
    %c1_i32 = arith.constant 1 : i32
    %18:2 = scf.for %arg10 = %c0_i32_19 to %17 step %c1_i32 iter_args(%arg11 = %15, %arg12 = %16) -> (vector<16x32xf32>, vector<16x32xf32>)  : i32 {
      %c1_i32_25 = arith.constant 1 : i32
      %21 = arith.subi %c1_i32_25, %arg0 : i32
      %22 = arith.muli %21, %arg10 : i32
      %c7_i32 = arith.constant 7 : i32
      %23 = arith.subi %c7_i32, %arg10 : i32
      %24 = arith.muli %arg0, %23 : i32
      %25 = arith.addi %22, %24 : i32
      %c16_i32 = arith.constant 16 : i32
      %26 = arith.muli %25, %c16_i32 : i32
      %27 = tpu.assume_multiple %26, 16 : i32
      %28 = arith.index_cast %27 : i32 to index
      %c0_26 = arith.constant 0 : index
      %29 = vector.load %arg9[%28, %c0_26] : memref<128x128xf32, #tpu.memory_space<vmem>>, vector<16x128xf32>
      %30 = arith.truncf %arg11 : vector<16x32xf32> to vector<16x32xbf16>
      %cst_27 = arith.constant dense<0.000000e+00> : vector<16x128xf32>
      %31 = tpu.matmul %30, %14, %cst_27 {dimension_numbers = #tpu.dot_dimension_numbers<[1], [0], [0], [1], [0, 0, 1, 1], [], []>} : vector<16x32xbf16>, vector<32x128xbf16>, vector<16x128xf32> -> vector<16x128xf32>
      %32 = arith.addf %29, %31 : vector<16x128xf32>
      %33 = vector.extract_strided_slice %32 {offsets = [0, 0], sizes = [16, 32], strides = [1, 1]} : vector<16x128xf32> to vector<16x32xf32>
      %34 = arith.negf %33 : vector<16x32xf32>
      %35 = math.exp %34 : vector<16x32xf32>
      %cst_28 = arith.constant 1.000000e+00 : f32
      %36 = vector.broadcast %cst_28 : f32 to vector<16x32xf32>
      %37 = arith.addf %36, %35 : vector<16x32xf32>
      %38 = arith.divf %36, %37 : vector<16x32xf32>
      %39 = vector.extract_strided_slice %32 {offsets = [0, 32], sizes = [16, 32], strides = [1, 1]} : vector<16x128xf32> to vector<16x32xf32>
      %40 = arith.negf %39 : vector<16x32xf32>
      %41 = math.exp %40 : vector<16x32xf32>
      %cst_29 = arith.constant 1.000000e+00 : f32
      %42 = vector.broadcast %cst_29 : f32 to vector<16x32xf32>
      %43 = arith.addf %42, %41 : vector<16x32xf32>
      %44 = arith.divf %42, %43 : vector<16x32xf32>
      %45 = vector.extract_strided_slice %32 {offsets = [0, 64], sizes = [16, 32], strides = [1, 1]} : vector<16x128xf32> to vector<16x32xf32>
      %46 = math.tanh %45 : vector<16x32xf32>
      %47 = vector.extract_strided_slice %32 {offsets = [0, 96], sizes = [16, 32], strides = [1, 1]} : vector<16x128xf32> to vector<16x32xf32>
      %48 = arith.negf %47 : vector<16x32xf32>
      %49 = math.exp %48 : vector<16x32xf32>
      %cst_30 = arith.constant 1.000000e+00 : f32
      %50 = vector.broadcast %cst_30 : f32 to vector<16x32xf32>
      %51 = arith.addf %50, %49 : vector<16x32xf32>
      %52 = arith.divf %50, %51 : vector<16x32xf32>
      %53 = arith.mulf %44, %arg12 : vector<16x32xf32>
      %54 = arith.mulf %38, %46 : vector<16x32xf32>
      %55 = arith.addf %53, %54 : vector<16x32xf32>
      %56 = math.tanh %55 : vector<16x32xf32>
      %57 = arith.mulf %52, %56 : vector<16x32xf32>
      %58 = arith.truncf %57 : vector<16x32xf32> to vector<16x32xbf16>
      %c0_31 = arith.constant 0 : index
      %59 = arith.index_cast %27 : i32 to index
      %c0_32 = arith.constant 0 : index
      %60 = vector.load %arg6[%c0_31, %59, %c0_32] : memref<1x128x32xbf16, #tpu.memory_space<vmem>>, vector<1x16x32xbf16>
      %61 = vector.shape_cast %60 : vector<1x16x32xbf16> to vector<16x32xbf16>
      %62 = vector.shape_cast %58 : vector<16x32xbf16> to vector<1x16x32xbf16>
      tpu.vector_store %arg6[%c0_31, %59, %c0_32], %62 {strides = array<i32>} : memref<1x128x32xbf16, #tpu.memory_space<vmem>>, vector<1x16x32xbf16>,
      scf.yield %57, %55 : vector<16x32xf32>, vector<16x32xf32>
    }
    %c8_i32_20 = arith.constant 8 : i32
    %c0_21 = arith.constant 0 : index
    %c0_22 = arith.constant 0 : index
    %19 = vector.load %arg7[%c0_21, %c0_22] : memref<16x32xf32, #tpu.memory_space<vmem>>, vector<16x32xf32>
    tpu.vector_store %arg7[%c0_21, %c0_22], %18#0 {strides = array<i32>} : memref<16x32xf32, #tpu.memory_space<vmem>>, vector<16x32xf32>,
    %c0_23 = arith.constant 0 : index
    %c0_24 = arith.constant 0 : index
    %20 = vector.load %arg8[%c0_23, %c0_24] : memref<16x32xf32, #tpu.memory_space<vmem>>, vector<16x32xf32>
    tpu.vector_store %arg8[%c0_23, %c0_24], %18#1 {strides = array<i32>} : memref<16x32xf32, #tpu.memory_space<vmem>>, vector<16x32xf32>,
    return
  }
  func.func @transform_0(%arg0: i32, %arg1: i32) -> (i32, i32, i32) {
    %c1_i32 = arith.constant 1 : i32
    %0 = arith.subi %c1_i32, %arg0 : i32
    %1 = arith.muli %0, %arg1 : i32
    %c0_i32 = arith.constant 0 : i32
    %2 = arith.subi %c0_i32, %arg1 : i32
    %3 = arith.muli %arg0, %2 : i32
    %4 = arith.addi %1, %3 : i32
    %c0_i32_0 = arith.constant 0 : i32
    %c0_i32_1 = arith.constant 0 : i32
    %c0_i32_2 = arith.constant 0 : i32
    return %c0_i32_0, %4, %c0_i32_1 : i32, i32, i32
  }
  func.func @transform_1(%arg0: i32, %arg1: i32) -> (i32, i32, i32, i32) {
    %c0_i32 = arith.constant 0 : i32
    %c0_i32_0 = arith.constant 0 : i32
    %c0_i32_1 = arith.constant 0 : i32
    %c0_i32_2 = arith.constant 0 : i32
    return %arg0, %c0_i32, %c0_i32_0, %c0_i32_1 : i32, i32, i32, i32
  }
  func.func @transform_2(%arg0: i32, %arg1: i32) -> (i32, i32, i32) {
    %c0_i32 = arith.constant 0 : i32
    %c0_i32_0 = arith.constant 0 : i32
    %c0_i32_1 = arith.constant 0 : i32
    return %arg0, %c0_i32, %c0_i32_0 : i32, i32, i32
  }
  func.func @transform_3(%arg0: i32, %arg1: i32) -> (i32, i32, i32) {
    %c0_i32 = arith.constant 0 : i32
    %c0_i32_0 = arith.constant 0 : i32
    %c0_i32_1 = arith.constant 0 : i32
    return %arg0, %c0_i32, %c0_i32_0 : i32, i32, i32
  }
  func.func @transform_4(%arg0: i32, %arg1: i32) -> (i32, i32, i32) {
    %c1_i32 = arith.constant 1 : i32
    %0 = arith.subi %c1_i32, %arg0 : i32
    %1 = arith.muli %0, %arg1 : i32
    %c0_i32 = arith.constant 0 : i32
    %2 = arith.subi %c0_i32, %arg1 : i32
    %3 = arith.muli %arg0, %2 : i32
    %4 = arith.addi %1, %3 : i32
    %c0_i32_0 = arith.constant 0 : i32
    %c0_i32_1 = arith.constant 0 : i32
    return %arg0, %4, %c0_i32_0 : i32, i32, i32
  }
}

module attributes {stable_mosaic.version = 11 : i64} {
  func.func @_last_layer_head_kernel(%arg0: i32, %arg1: memref<2x128x32xbf16, #tpu.memory_space<vmem>>, %arg2: memref<2x2x32x128xbf16, #tpu.memory_space<vmem>>, %arg3: memref<2x32x128xbf16, #tpu.memory_space<vmem>>, %arg4: memref<2x1x128xf32, #tpu.memory_space<vmem>>, %arg5: memref<2x32x2xf32, #tpu.memory_space<vmem>>, %arg6: memref<1x2xf32, #tpu.memory_space<vmem>>, %arg7: memref<16x2xf32, #tpu.memory_space<vmem>>, %arg8: memref<16x32xf32, #tpu.memory_space<vmem>>, %arg9: memref<16x32xf32, #tpu.memory_space<vmem>>, %arg10: memref<128x128xf32, #tpu.memory_space<vmem>>) attributes {dimension_semantics = [#tpu.dimension_semantics<arbitrary>], iteration_bounds = array<i64: 1>, scalar_prefetch = 0 : i64, scratch_operands = 3 : i64, tpu.core_type = #tpu.core_type<tc>, window_params = [{transform_indices = @transform_0, window_bounds = array<i64: 2, 128, 32>}, {pipeline_mode = #tpu.pipeline_mode<synchronous>, transform_indices = @transform_1, window_bounds = array<i64: 2, 2, 32, 128>}, {pipeline_mode = #tpu.pipeline_mode<synchronous>, transform_indices = @transform_2, window_bounds = array<i64: 2, 32, 128>}, {pipeline_mode = #tpu.pipeline_mode<synchronous>, transform_indices = @transform_3, window_bounds = array<i64: 2, 1, 128>}, {pipeline_mode = #tpu.pipeline_mode<synchronous>, transform_indices = @transform_4, window_bounds = array<i64: 2, 32, 2>}, {pipeline_mode = #tpu.pipeline_mode<synchronous>, transform_indices = @transform_5, window_bounds = array<i64: 1, 2>}, {pipeline_mode = #tpu.pipeline_mode<synchronous>, transform_indices = @transform_6, window_bounds = array<i64: 16, 2>}]} {
    %c0_i32 = arith.constant 0 : i32
    %0 = arith.cmpi eq, %arg0, %c0_i32 : i32
    %1 = arith.extui %0 : i1 to i32
    %c0_i32_0 = arith.constant 0 : i32
    %2 = arith.cmpi ne, %1, %c0_i32_0 : i32
    scf.if %2 {
      %cst_34 = arith.constant 0.000000e+00 : f32
      %30 = vector.broadcast %cst_34 : f32 to vector<16x32xf32>
      %c0_35 = arith.constant 0 : index
      %c0_36 = arith.constant 0 : index
      %31 = vector.load %arg8[%c0_35, %c0_36] : memref<16x32xf32, #tpu.memory_space<vmem>>, vector<16x32xf32>
      tpu.vector_store %arg8[%c0_35, %c0_36], %30 {strides = array<i32>} : memref<16x32xf32, #tpu.memory_space<vmem>>, vector<16x32xf32>,
      %cst_37 = arith.constant 0.000000e+00 : f32
      %32 = vector.broadcast %cst_37 : f32 to vector<16x32xf32>
      %c0_38 = arith.constant 0 : index
      %c0_39 = arith.constant 0 : index
      %33 = vector.load %arg9[%c0_38, %c0_39] : memref<16x32xf32, #tpu.memory_space<vmem>>, vector<16x32xf32>
      tpu.vector_store %arg9[%c0_38, %c0_39], %32 {strides = array<i32>} : memref<16x32xf32, #tpu.memory_space<vmem>>, vector<16x32xf32>,
    } else {
    }
    %c0 = arith.constant 0 : index
    %c0_1 = arith.constant 0 : index
    %c0_2 = arith.constant 0 : index
    %3 = vector.load %arg1[%c0, %c0_1, %c0_2] : memref<2x128x32xbf16, #tpu.memory_space<vmem>>, vector<1x128x32xbf16>
    %4 = vector.shape_cast %3 : vector<1x128x32xbf16> to vector<128x32xbf16>
    %c0_3 = arith.constant 0 : index
    %c0_4 = arith.constant 0 : index
    %c0_5 = arith.constant 0 : index
    %c0_6 = arith.constant 0 : index
    %5 = vector.load %arg2[%c0_3, %c0_4, %c0_5, %c0_6] : memref<2x2x32x128xbf16, #tpu.memory_space<vmem>>, vector<1x1x32x128xbf16>
    %6 = vector.shape_cast %5 : vector<1x1x32x128xbf16> to vector<32x128xbf16>
    %cst = arith.constant dense<0.000000e+00> : vector<128x128xf32>
    %7 = tpu.matmul %4, %6, %cst {dimension_numbers = #tpu.dot_dimension_numbers<[1], [0], [0], [1], [0, 0, 1, 1], [], []>} : vector<128x32xbf16>, vector<32x128xbf16>, vector<128x128xf32> -> vector<128x128xf32>
    %c1 = arith.constant 1 : index
    %c0_7 = arith.constant 0 : index
    %c0_8 = arith.constant 0 : index
    %8 = vector.load %arg1[%c1, %c0_7, %c0_8] : memref<2x128x32xbf16, #tpu.memory_space<vmem>>, vector<1x128x32xbf16>
    %9 = vector.shape_cast %8 : vector<1x128x32xbf16> to vector<128x32xbf16>
    %c0_9 = arith.constant 0 : index
    %c1_10 = arith.constant 1 : index
    %c0_11 = arith.constant 0 : index
    %c0_12 = arith.constant 0 : index
    %10 = vector.load %arg2[%c0_9, %c1_10, %c0_11, %c0_12] : memref<2x2x32x128xbf16, #tpu.memory_space<vmem>>, vector<1x1x32x128xbf16>
    %11 = vector.shape_cast %10 : vector<1x1x32x128xbf16> to vector<32x128xbf16>
    %cst_13 = arith.constant dense<0.000000e+00> : vector<128x128xf32>
    %12 = tpu.matmul %9, %11, %cst_13 {dimension_numbers = #tpu.dot_dimension_numbers<[1], [0], [0], [1], [0, 0, 1, 1], [], []>} : vector<128x32xbf16>, vector<32x128xbf16>, vector<128x128xf32> -> vector<128x128xf32>
    %13 = arith.addf %7, %12 : vector<128x128xf32>
    %c0_14 = arith.constant 0 : index
    %c0_15 = arith.constant 0 : index
    %c0_16 = arith.constant 0 : index
    %14 = vector.load %arg4[%c0_14, %c0_15, %c0_16] : memref<2x1x128xf32, #tpu.memory_space<vmem>>, vector<1x1x128xf32>
    %15 = vector.shape_cast %14 : vector<1x1x128xf32> to vector<1x128xf32>
    %16 = vector.broadcast %15 : vector<1x128xf32> to vector<128x128xf32>
    %17 = arith.addf %13, %16 : vector<128x128xf32>
    %c0_17 = arith.constant 0 : index
    %c0_18 = arith.constant 0 : index
    %18 = vector.load %arg10[%c0_17, %c0_18] : memref<128x128xf32, #tpu.memory_space<vmem>>, vector<128x128xf32>
    tpu.vector_store %arg10[%c0_17, %c0_18], %17 {strides = array<i32>} : memref<128x128xf32, #tpu.memory_space<vmem>>, vector<128x128xf32>,
    %c0_19 = arith.constant 0 : index
    %c0_20 = arith.constant 0 : index
    %c0_21 = arith.constant 0 : index
    %19 = vector.load %arg3[%c0_19, %c0_20, %c0_21] : memref<2x32x128xbf16, #tpu.memory_space<vmem>>, vector<1x32x128xbf16>
    %20 = vector.shape_cast %19 : vector<1x32x128xbf16> to vector<32x128xbf16>
    %c0_22 = arith.constant 0 : index
    %c0_23 = arith.constant 0 : index
    %21 = vector.load %arg8[%c0_22, %c0_23] : memref<16x32xf32, #tpu.memory_space<vmem>>, vector<16x32xf32>
    %c0_24 = arith.constant 0 : index
    %c0_25 = arith.constant 0 : index
    %22 = vector.load %arg9[%c0_24, %c0_25] : memref<16x32xf32, #tpu.memory_space<vmem>>, vector<16x32xf32>
    %c0_i32_26 = arith.constant 0 : i32
    %c8_i32 = arith.constant 8 : i32
    %23 = arith.addi %c0_i32_26, %c8_i32 : i32
    %c1_i32 = arith.constant 1 : i32
    %24:2 = scf.for %arg11 = %c0_i32_26 to %23 step %c1_i32 iter_args(%arg12 = %21, %arg13 = %22) -> (vector<16x32xf32>, vector<16x32xf32>)  : i32 {
      %c16_i32 = arith.constant 16 : i32
      %30 = arith.muli %arg11, %c16_i32 : i32
      %31 = tpu.assume_multiple %30, 16 : i32
      %32 = arith.index_cast %31 : i32 to index
      %c0_34 = arith.constant 0 : index
      %33 = vector.load %arg10[%32, %c0_34] : memref<128x128xf32, #tpu.memory_space<vmem>>, vector<16x128xf32>
      %34 = arith.truncf %arg12 : vector<16x32xf32> to vector<16x32xbf16>
      %cst_35 = arith.constant dense<0.000000e+00> : vector<16x128xf32>
      %35 = tpu.matmul %34, %20, %cst_35 {dimension_numbers = #tpu.dot_dimension_numbers<[1], [0], [0], [1], [0, 0, 1, 1], [], []>} : vector<16x32xbf16>, vector<32x128xbf16>, vector<16x128xf32> -> vector<16x128xf32>
      %36 = arith.addf %33, %35 : vector<16x128xf32>
      %37 = vector.extract_strided_slice %36 {offsets = [0, 0], sizes = [16, 32], strides = [1, 1]} : vector<16x128xf32> to vector<16x32xf32>
      %38 = arith.negf %37 : vector<16x32xf32>
      %39 = math.exp %38 : vector<16x32xf32>
      %cst_36 = arith.constant 1.000000e+00 : f32
      %40 = vector.broadcast %cst_36 : f32 to vector<16x32xf32>
      %41 = arith.addf %40, %39 : vector<16x32xf32>
      %42 = arith.divf %40, %41 : vector<16x32xf32>
      %43 = vector.extract_strided_slice %36 {offsets = [0, 32], sizes = [16, 32], strides = [1, 1]} : vector<16x128xf32> to vector<16x32xf32>
      %44 = arith.negf %43 : vector<16x32xf32>
      %45 = math.exp %44 : vector<16x32xf32>
      %cst_37 = arith.constant 1.000000e+00 : f32
      %46 = vector.broadcast %cst_37 : f32 to vector<16x32xf32>
      %47 = arith.addf %46, %45 : vector<16x32xf32>
      %48 = arith.divf %46, %47 : vector<16x32xf32>
      %49 = vector.extract_strided_slice %36 {offsets = [0, 64], sizes = [16, 32], strides = [1, 1]} : vector<16x128xf32> to vector<16x32xf32>
      %50 = math.tanh %49 : vector<16x32xf32>
      %51 = vector.extract_strided_slice %36 {offsets = [0, 96], sizes = [16, 32], strides = [1, 1]} : vector<16x128xf32> to vector<16x32xf32>
      %52 = arith.negf %51 : vector<16x32xf32>
      %53 = math.exp %52 : vector<16x32xf32>
      %cst_38 = arith.constant 1.000000e+00 : f32
      %54 = vector.broadcast %cst_38 : f32 to vector<16x32xf32>
      %55 = arith.addf %54, %53 : vector<16x32xf32>
      %56 = arith.divf %54, %55 : vector<16x32xf32>
      %57 = arith.mulf %48, %arg13 : vector<16x32xf32>
      %58 = arith.mulf %42, %50 : vector<16x32xf32>
      %59 = arith.addf %57, %58 : vector<16x32xf32>
      %60 = math.tanh %59 : vector<16x32xf32>
      %61 = arith.mulf %56, %60 : vector<16x32xf32>
      scf.yield %61, %59 : vector<16x32xf32>, vector<16x32xf32>
    }
    %c8_i32_27 = arith.constant 8 : i32
    %c0_28 = arith.constant 0 : index
    %c0_29 = arith.constant 0 : index
    %25 = vector.load %arg8[%c0_28, %c0_29] : memref<16x32xf32, #tpu.memory_space<vmem>>, vector<16x32xf32>
    tpu.vector_store %arg8[%c0_28, %c0_29], %24#0 {strides = array<i32>} : memref<16x32xf32, #tpu.memory_space<vmem>>, vector<16x32xf32>,
    %c0_30 = arith.constant 0 : index
    %c0_31 = arith.constant 0 : index
    %26 = vector.load %arg9[%c0_30, %c0_31] : memref<16x32xf32, #tpu.memory_space<vmem>>, vector<16x32xf32>
    tpu.vector_store %arg9[%c0_30, %c0_31], %24#1 {strides = array<i32>} : memref<16x32xf32, #tpu.memory_space<vmem>>, vector<16x32xf32>,
    %c0_i32_32 = arith.constant 0 : i32
    %27 = arith.cmpi eq, %arg0, %c0_i32_32 : i32
    %28 = arith.extui %27 : i1 to i32
    %c0_i32_33 = arith.constant 0 : i32
    %29 = arith.cmpi ne, %28, %c0_i32_33 : i32
    scf.if %29 {
      %c0_34 = arith.constant 0 : index
      %c112 = arith.constant 112 : index
      %c0_35 = arith.constant 0 : index
      %30 = vector.load %arg1[%c0_34, %c112, %c0_35] : memref<2x128x32xbf16, #tpu.memory_space<vmem>>, vector<1x16x32xbf16>
      %31 = vector.shape_cast %30 : vector<1x16x32xbf16> to vector<16x32xbf16>
      %c1_36 = arith.constant 1 : index
      %c0_37 = arith.constant 0 : index
      %c0_38 = arith.constant 0 : index
      %c0_39 = arith.constant 0 : index
      %32 = vector.load %arg2[%c1_36, %c0_37, %c0_38, %c0_39] : memref<2x2x32x128xbf16, #tpu.memory_space<vmem>>, vector<1x1x32x128xbf16>
      %33 = vector.shape_cast %32 : vector<1x1x32x128xbf16> to vector<32x128xbf16>
      %cst_40 = arith.constant dense<0.000000e+00> : vector<16x128xf32>
      %34 = tpu.matmul %31, %33, %cst_40 {dimension_numbers = #tpu.dot_dimension_numbers<[1], [0], [0], [1], [0, 0, 1, 1], [], []>} : vector<16x32xbf16>, vector<32x128xbf16>, vector<16x128xf32> -> vector<16x128xf32>
      %c1_41 = arith.constant 1 : index
      %c112_42 = arith.constant 112 : index
      %c0_43 = arith.constant 0 : index
      %35 = vector.load %arg1[%c1_41, %c112_42, %c0_43] : memref<2x128x32xbf16, #tpu.memory_space<vmem>>, vector<1x16x32xbf16>
      %36 = vector.shape_cast %35 : vector<1x16x32xbf16> to vector<16x32xbf16>
      %c1_44 = arith.constant 1 : index
      %c1_45 = arith.constant 1 : index
      %c0_46 = arith.constant 0 : index
      %c0_47 = arith.constant 0 : index
      %37 = vector.load %arg2[%c1_44, %c1_45, %c0_46, %c0_47] : memref<2x2x32x128xbf16, #tpu.memory_space<vmem>>, vector<1x1x32x128xbf16>
      %38 = vector.shape_cast %37 : vector<1x1x32x128xbf16> to vector<32x128xbf16>
      %cst_48 = arith.constant dense<0.000000e+00> : vector<16x128xf32>
      %39 = tpu.matmul %36, %38, %cst_48 {dimension_numbers = #tpu.dot_dimension_numbers<[1], [0], [0], [1], [0, 0, 1, 1], [], []>} : vector<16x32xbf16>, vector<32x128xbf16>, vector<16x128xf32> -> vector<16x128xf32>
      %40 = arith.addf %34, %39 : vector<16x128xf32>
      %c1_49 = arith.constant 1 : index
      %c0_50 = arith.constant 0 : index
      %c0_51 = arith.constant 0 : index
      %41 = vector.load %arg4[%c1_49, %c0_50, %c0_51] : memref<2x1x128xf32, #tpu.memory_space<vmem>>, vector<1x1x128xf32>
      %42 = vector.shape_cast %41 : vector<1x1x128xf32> to vector<1x128xf32>
      %43 = vector.broadcast %42 : vector<1x128xf32> to vector<16x128xf32>
      %44 = arith.addf %40, %43 : vector<16x128xf32>
      %45 = vector.extract_strided_slice %44 {offsets = [0, 0], sizes = [16, 32], strides = [1, 1]} : vector<16x128xf32> to vector<16x32xf32>
      %46 = arith.negf %45 : vector<16x32xf32>
      %47 = math.exp %46 : vector<16x32xf32>
      %cst_52 = arith.constant 1.000000e+00 : f32
      %48 = vector.broadcast %cst_52 : f32 to vector<16x32xf32>
      %49 = arith.addf %48, %47 : vector<16x32xf32>
      %50 = arith.divf %48, %49 : vector<16x32xf32>
      %51 = vector.extract_strided_slice %44 {offsets = [0, 64], sizes = [16, 32], strides = [1, 1]} : vector<16x128xf32> to vector<16x32xf32>
      %52 = math.tanh %51 : vector<16x32xf32>
      %53 = vector.extract_strided_slice %44 {offsets = [0, 96], sizes = [16, 32], strides = [1, 1]} : vector<16x128xf32> to vector<16x32xf32>
      %54 = arith.negf %53 : vector<16x32xf32>
      %55 = math.exp %54 : vector<16x32xf32>
      %cst_53 = arith.constant 1.000000e+00 : f32
      %56 = vector.broadcast %cst_53 : f32 to vector<16x32xf32>
      %57 = arith.addf %56, %55 : vector<16x32xf32>
      %58 = arith.divf %56, %57 : vector<16x32xf32>
      %59 = arith.mulf %50, %52 : vector<16x32xf32>
      %60 = math.tanh %59 : vector<16x32xf32>
      %61 = arith.mulf %58, %60 : vector<16x32xf32>
      %62 = arith.negf %24#0 : vector<16x32xf32>
      %63 = math.exp %62 : vector<16x32xf32>
      %cst_54 = arith.constant 1.000000e+00 : f32
      %64 = vector.broadcast %cst_54 : f32 to vector<16x32xf32>
      %65 = arith.addf %64, %63 : vector<16x32xf32>
      %66 = arith.divf %64, %65 : vector<16x32xf32>
      %67 = arith.negf %61 : vector<16x32xf32>
      %68 = math.exp %67 : vector<16x32xf32>
      %cst_55 = arith.constant 1.000000e+00 : f32
      %69 = vector.broadcast %cst_55 : f32 to vector<16x32xf32>
      %70 = arith.addf %69, %68 : vector<16x32xf32>
      %71 = arith.divf %69, %70 : vector<16x32xf32>
      %c0_56 = arith.constant 0 : index
      %c0_57 = arith.constant 0 : index
      %c0_58 = arith.constant 0 : index
      %72 = vector.load %arg5[%c0_56, %c0_57, %c0_58] : memref<2x32x2xf32, #tpu.memory_space<vmem>>, vector<1x32x2xf32>
      %73 = vector.shape_cast %72 : vector<1x32x2xf32> to vector<32x2xf32>
      %cst_59 = arith.constant dense<0.000000e+00> : vector<16x2xf32>
      %74 = tpu.matmul %66, %73, %cst_59 {dimension_numbers = #tpu.dot_dimension_numbers<[1], [0], [0], [1], [0, 0, 1, 1], [], []>} : vector<16x32xf32>, vector<32x2xf32>, vector<16x2xf32> -> vector<16x2xf32>
      %c1_60 = arith.constant 1 : index
      %c0_61 = arith.constant 0 : index
      %c0_62 = arith.constant 0 : index
      %75 = vector.load %arg5[%c1_60, %c0_61, %c0_62] : memref<2x32x2xf32, #tpu.memory_space<vmem>>, vector<1x32x2xf32>
      %76 = vector.shape_cast %75 : vector<1x32x2xf32> to vector<32x2xf32>
      %cst_63 = arith.constant dense<0.000000e+00> : vector<16x2xf32>
      %77 = tpu.matmul %71, %76, %cst_63 {dimension_numbers = #tpu.dot_dimension_numbers<[1], [0], [0], [1], [0, 0, 1, 1], [], []>} : vector<16x32xf32>, vector<32x2xf32>, vector<16x2xf32> -> vector<16x2xf32>
      %78 = arith.addf %74, %77 : vector<16x2xf32>
      %c0_64 = arith.constant 0 : index
      %c0_65 = arith.constant 0 : index
      %79 = vector.load %arg6[%c0_64, %c0_65] : memref<1x2xf32, #tpu.memory_space<vmem>>, vector<1x2xf32>
      %80 = vector.broadcast %79 : vector<1x2xf32> to vector<16x2xf32>
      %81 = arith.addf %78, %80 : vector<16x2xf32>
      %c0_66 = arith.constant 0 : index
      %c0_67 = arith.constant 0 : index
      %82 = vector.load %arg7[%c0_66, %c0_67] : memref<16x2xf32, #tpu.memory_space<vmem>>, vector<16x2xf32>
      tpu.vector_store %arg7[%c0_66, %c0_67], %81 {strides = array<i32>} : memref<16x2xf32, #tpu.memory_space<vmem>>, vector<16x2xf32>,
    } else {
    }
    return
  }
  func.func @transform_0(%arg0: i32) -> (i32, i32, i32) {
    %c0_i32 = arith.constant 0 : i32
    %c0_i32_0 = arith.constant 0 : i32
    %c0_i32_1 = arith.constant 0 : i32
    return %c0_i32, %arg0, %c0_i32_0 : i32, i32, i32
  }
  func.func @transform_1(%arg0: i32) -> (i32, i32, i32, i32) {
    %c0_i32 = arith.constant 0 : i32
    %c0_i32_0 = arith.constant 0 : i32
    %c0_i32_1 = arith.constant 0 : i32
    %c0_i32_2 = arith.constant 0 : i32
    %c0_i32_3 = arith.constant 0 : i32
    return %c0_i32, %c0_i32_0, %c0_i32_1, %c0_i32_2 : i32, i32, i32, i32
  }
  func.func @transform_2(%arg0: i32) -> (i32, i32, i32) {
    %c0_i32 = arith.constant 0 : i32
    %c0_i32_0 = arith.constant 0 : i32
    %c0_i32_1 = arith.constant 0 : i32
    %c0_i32_2 = arith.constant 0 : i32
    return %c0_i32, %c0_i32_0, %c0_i32_1 : i32, i32, i32
  }
  func.func @transform_3(%arg0: i32) -> (i32, i32, i32) {
    %c0_i32 = arith.constant 0 : i32
    %c0_i32_0 = arith.constant 0 : i32
    %c0_i32_1 = arith.constant 0 : i32
    %c0_i32_2 = arith.constant 0 : i32
    return %c0_i32, %c0_i32_0, %c0_i32_1 : i32, i32, i32
  }
  func.func @transform_4(%arg0: i32) -> (i32, i32, i32) {
    %c0_i32 = arith.constant 0 : i32
    %c0_i32_0 = arith.constant 0 : i32
    %c0_i32_1 = arith.constant 0 : i32
    %c0_i32_2 = arith.constant 0 : i32
    return %c0_i32, %c0_i32_0, %c0_i32_1 : i32, i32, i32
  }
  func.func @transform_5(%arg0: i32) -> (i32, i32) {
    %c0_i32 = arith.constant 0 : i32
    %c0_i32_0 = arith.constant 0 : i32
    %c0_i32_1 = arith.constant 0 : i32
    return %c0_i32, %c0_i32_0 : i32, i32
  }
  func.func @transform_6(%arg0: i32) -> (i32, i32) {
    %c0_i32 = arith.constant 0 : i32
    %c0_i32_0 = arith.constant 0 : i32
    %c0_i32_1 = arith.constant 0 : i32
    return %c0_i32, %c0_i32_0 : i32, i32
  }
}

</mosaic_0001>

<bundles_post_ra>
// kernel: lstm_classifier_forward.2
= control target key start
LH: loop header
LB: loop body
LE: loop exit
PB: predicated region body
PF: predicated region fallthrough
CT: control target
= control target key end

     0   :  { %s1166_s15 = smov 0   ;;  %s1168_s16 = smov 0   ;;  %s1319_s0 = inlined_call_operand.vmem [shape: bf16[1,128,16], index: 0, kind: input, shape index: {}]   ;;  %s1320_s1 = inlined_call_operand.vmem [shape: bf16[2,1,16,128], index: 1, kind: input, shape index: {}]   ;;  %s1321_s2 = inlined_call_operand.vmem [shape: bf16[2,32,128], index: 2, kind: input, shape index: {}]   ;;  %s1322_s3 = inlined_call_operand.vmem [shape: f32[2,1,128], index: 3, kind: input, shape index: {}]   ;;  %s1323_s4 = inlined_call_operand.vmem [shape: bf16[2,128,32], index: 4, kind: output, shape index: {}]  }
   0x1   :  { %s1170_s17 = smov 0  }
   0x2 LB: > { %s26_s18 = sadd.s32 1, %s1109_s16  ;;  %p895_p0 = scmp.ge.s32.totalorder %s1113_s17, 1  ;;  %s1113_s17 = sphi %s1170_s17, %s14_s17   ;;  %s1109_s16 = sphi %s1168_s16, %s1329_s16   ;;  %s1105_s15 = sphi %s1166_s15, %s1328_s15  }
   0x3   : > { %p28_p1 = scmp.ge.s32.totalorder %s26_s18, 2  ;;  %p235_p2 = scmp.lt.s32.totalorder %s1113_s17, 3 }
   0x5   : > { %s1331_s18 = smov (%p28_p1, %s26_s18), 0  ;;  %p236_p3 = pnand %p895_p0, %p235_p2 }
   0x6   : > { %p304_p4 = scmp.lt.s32.totalorder (!%p236_p3), %s1105_s15, 1 }
   0x7   : > { %239 = sbr.rel (%p236_p3) target bundleno = 942 (0x3ae), region = 36 }
   0xc   : > { %vm342_vm0 = vcmask 261120   ;;  %v1047_v0 = vld [vmem:[%s1319_s0] sm:$0xff]   ;;  %v1135_v1 = vmov 0.0   ;;  %vm418_vm1 = vcmask 130048   ;;  %s1198_s23 = scalar_select %p304_p4, %s1105_s15, 1  ;;  %v1049_v4 = vld [vmem:[%s1319_s0 + $0x8] sm:$0xff]  }
   0xd   : > { %343 = vst.msk [vmem:[#allocation2] sm:$0xff] %vm342_vm0, %v1135_v1  ;;  %344 = vst.msk [vmem:[#allocation2 + $0x8] sm:$0xff] %vm342_vm0, %v1135_v1  ;;  %v1048_v2 = vld [vmem:[%s1319_s0 + $0x20] sm:$0xff]   ;;  %950 = vmatprep.mubr.msk.bf16.mxu0 %vm418_vm1, %v1047_v0  ;;  %v1050_v7 = vld [vmem:[%s1319_s0 + $0x28] sm:$0xff]  }
   0xe   : > { %345 = vst.msk [vmem:[#allocation3] sm:$0xff] %vm342_vm0, %v1135_v1  ;;  %346 = vst.msk [vmem:[#allocation3 + $0x8] sm:$0xff] %vm342_vm0, %v1135_v1  ;;  %958 = vmatprep.mubr.msk.bf16.mxu1 %vm418_vm1, %v1048_v2  ;;  %s931_s24 = sshll.u32 %s1198_s23, 3  ;;  %s932_s25 = sshll.u32 %s1198_s23, 4  ;;  %v1051_v10 = vld [vmem:[%s1319_s0 + $0x10] sm:$0xff]   ;;  %v1053_v12 = vld [vmem:[%s1319_s0 + $0x18] sm:$0xff]  }
   0xf   : > { %s308_s28 = scalar_lea.vmem %s1320_s1, %s931_s24  ;;  %s313_s5 = scalar_lea.vmem %s1321_s2, %s932_s25  ;;  %v1052_v11 = vld [vmem:[%s1319_s0 + $0x30] sm:$0xff]   ;;  %v1054_v13 = vld [vmem:[%s1319_s0 + $0x38] sm:$0xff]  }
  0x10   : > { %s933_s6 = sshll.u32 %s1198_s23, 6  ;;  %v1046_v3 = vld [vmem:[%s308_s28] sm:$0xff]   ;;  %v1226_v8 = vld [vmem:[%s313_s5 + $0x8] sm:$0xf]  ;;  %v1228_v9 = vld [vmem:[%s313_s5 + $0xc] sm:$0xf]  ;;  %s316_s29 = scalar_lea.vmem %s1322_s3, %s1198_s23 }
  0x11   : > { %s1217_s11 = scalar_lea.vmem %s1323_s4, %s933_s6  ;;  %v1219_v5 = vld [vmem:[%s313_s5] sm:$0xf]  ;;  %v1221_v6 = vld [vmem:[%s313_s5 + $0x4] sm:$0xf]  ;;  %948 = vmatprep.subr.bf16.mxu0 %v1046_v3  ;;  %974 = vmatprep.subr.bf16.mxu1 %v1046_v3  ;;  %s1260_s23 = smov 0  }
  0x12   : > { %949 = vmatpush3.bf16.msra.mxu0 %v1046_v3  ;;  %975 = vmatpush3.bf16.msra.mxu1 %v1046_v3  ;;  %v902_v18 = vld [vmem:[%s316_s29] ss:$0 sm:$0xff] }
  0x14   : > { %v560_v14 = vld [vmem:[#allocation2] sm:$0xff]   ;;  %v561_v15 = vld [vmem:[#allocation2 + $0x8] sm:$0xff]  }
  0x15   : > { %951 = vmatmul.mubr.msk.bf16.vlgmr.msra.gmra.mxu0 %vm418_vm1, %v1049_v4  ;;  %959 = vmatmul.mubr.msk.bf16.vlgmr.msra.gmra.mxu1 %vm418_vm1, %v1050_v7  ;;  %v562_v16 = vld [vmem:[#allocation3] sm:$0xff]   ;;  %v563_v17 = vld [vmem:[#allocation3 + $0x8] sm:$0xff]  }
  0x16   : > { %954 = vmatprep.mubr.msk.bf16.mxu0 %vm418_vm1, %v1051_v10  ;;  %962 = vmatprep.mubr.msk.bf16.mxu1 %vm418_vm1, %v1052_v11 }
  0x1d   : > { %955 = vmatmul.mubr.msk.bf16.gmra.mxu0 %vm418_vm1, %v1053_v12  ;;  %963 = vmatmul.mubr.msk.bf16.gmra.mxu1 %vm418_vm1, %v1054_v13 }
  0xd5   : > { %v952_v19 = vpop.f32.mrf.mxu0  ;;  %v960_v20 = vpop.f32.mrf.mxu1 }
  0xd6   : > { %v486_v21 = vadd.f32 %v952_v19, %v902_v18  ;;  %v518_v22 = vadd.f32 %v960_v20, %v902_v18 }
  0xd7   : > { %v477_v23 = vpop.f32.mrf.mxu0  ;;  %v509_v24 = vpop.f32.mrf.mxu1 }
  0xd8   : > { %542 = vst [vmem:[#allocation4 + $0x10] sm:$0xff] %v486_v21  ;;  %550 = vst [vmem:[#allocation4 + $0x50] sm:$0xff] %v518_v22  ;;  %v478_v25 = vadd.f32 %v902_v18, %v477_v23  ;;  %v510_v26 = vadd.f32 %v902_v18, %v509_v24 }
  0xd9   : > { %v953_v27 = vpop.f32.mrf.mxu0  ;;  %v961_v28 = vpop.f32.mrf.mxu1 }
  0xda   : > { %540 = vst [vmem:[#allocation4] sm:$0xff] %v478_v25  ;;  %548 = vst [vmem:[#allocation4 + $0x40] sm:$0xff] %v510_v26  ;;  %v489_v29 = vadd.f32 %v953_v27, %v902_v18  ;;  %v521_v30 = vadd.f32 %v961_v28, %v902_v18 }
  0xdb   : > { %v480_v31 = vpop.f32.mrf.mxu0  ;;  %v512_v32 = vpop.f32.mrf.mxu1 }
  0xdc   : > { %543 = vst [vmem:[#allocation4 + $0x18] sm:$0xff] %v489_v29  ;;  %551 = vst [vmem:[#allocation4 + $0x58] sm:$0xff] %v521_v30  ;;  %v481_v33 = vadd.f32 %v902_v18, %v480_v31  ;;  %v513_v34 = vadd.f32 %v902_v18, %v512_v32 }
  0xdd   : > { %v956_v35 = vpop.f32.mrf.mxu0  ;;  %v964_v36 = vpop.f32.mrf.mxu1 }
  0xde   : > { %541 = vst [vmem:[#allocation4 + $0x8] sm:$0xff] %v481_v33  ;;  %549 = vst [vmem:[#allocation4 + $0x48] sm:$0xff] %v513_v34  ;;  %v502_v37 = vadd.f32 %v956_v35, %v902_v18  ;;  %v534_v38 = vadd.f32 %v964_v36, %v902_v18 }
  0xdf   : > { %v493_v39 = vpop.f32.mrf.mxu0  ;;  %v525_v40 = vpop.f32.mrf.mxu1 }
  0xe0   : > { %546 = vst [vmem:[#allocation4 + $0x30] sm:$0xff] %v502_v37  ;;  %554 = vst [vmem:[#allocation4 + $0x70] sm:$0xff] %v534_v38  ;;  %v494_v41 = vadd.f32 %v902_v18, %v493_v39  ;;  %v526_v42 = vadd.f32 %v902_v18, %v525_v40 }
  0xe1   : > { %v957_v43 = vpop.f32.mrf.mxu0  ;;  %v965_v44 = vpop.f32.mrf.mxu1 }
  0xe2   : > { %544 = vst [vmem:[#allocation4 + $0x20] sm:$0xff] %v494_v41  ;;  %552 = vst [vmem:[#allocation4 + $0x60] sm:$0xff] %v526_v42  ;;  %v505_v45 = vadd.f32 %v957_v43, %v902_v18  ;;  %v537_v46 = vadd.f32 %v965_v44, %v902_v18 }
  0xe3   : > { %v496_v47 = vpop.f32.mrf.mxu0  ;;  %v528_v48 = vpop.f32.mrf.mxu1 }
  0xe4   : > { %547 = vst [vmem:[#allocation4 + $0x38] sm:$0xff] %v505_v45  ;;  %555 = vst [vmem:[#allocation4 + $0x78] sm:$0xff] %v537_v46  ;;  %v497_v49 = vadd.f32 %v902_v18, %v496_v47  ;;  %v529_v50 = vadd.f32 %v902_v18, %v528_v48 }
  0xe6   : > { %545 = vst [vmem:[#allocation4 + $0x28] sm:$0xff] %v497_v49  ;;  %553 = vst [vmem:[#allocation4 + $0x68] sm:$0xff] %v529_v50 }
  0xe7 LB: >> { %v922_v51 = vcombine.low %v1226_v8, %v1228_v9  ;;  %v1136_v52 = vmov 0.0   ;;  %vm1137_vm2 = vmmov 0   ;;  %v921_v53 = vcombine.low %v1219_v5, %v1221_v6  ;;  %s1138_s30 = smov 32   ;;  %s574_s5 = ssub.s32 1, %s1105_s15  ;;  %s1133_s23 = sphi %s1260_s23, %s569_s23   ;;  %v1129_v14 = vphi %v560_v14, %v1327_v14   ;;  %v1125_v15 = vphi %v561_v15, %v1326_v15   ;;  %v1121_v16 = vphi %v562_v16, %v1325_v16   ;;  %v1117_v17 = vphi %v563_v17, %v1324_v17  }
  0xe8   : >> { %966 = vmatprep.subr.bf16.mxu0 %v1136_v52  ;;  %970 = vmatprep.mubr.msk.bf16.mxu0 %vm1137_vm2, %v1136_v52  ;;  %v583_v54 = vpack.c.bf16 %v1125_v15, %v1129_v14  ;;  %s576_s6 = ssub.s32 7, %s1133_s23  ;;  %s575_s7 = smul.u32 %s1133_s23, %s574_s5  ;;  %vm715_vm3 = vcmask 257024  }
  0xe9   : >> { %967 = vmatpush3.bf16.msra.mxu0 %v922_v51  ;;  %659 = vrot.lane.b32.xlu1 %v1121_v16, %s1138_s30  ;;  %s577_s8 = smul.u32 %s1105_s15, %s576_s6  ;;  %s1139_s13 = smov 64  }
  0xea   : >> { %968 = vmatprep.subr.bf16.mxu0 %v1136_v52  ;;  %s1140_s14 = smov 96   ;;  %s569_s23 = sadd.s32 1, %s1133_s23  }
  0xeb   : >> { %s578_s9 = sadd.s32 %s577_s8, %s575_s7  ;;  %p566_p5 = scmp.ge.s32.totalorder %s569_s23, 8  }
  0xec   : >> { %s1280_s10 = sshll.u32 %s578_s9, 4 }
  0xed   : >> { %969 = vmatpush3.bf16.msra.mxu0 %v921_v53  ;;  %661 = vrot.lane.b32.xlu1 %v1117_v17, %s1138_s30  ;;  %s580_s12 = scalar_lea.vmem [#allocation4], %s1280_s10  ;;  %s711_s19 = sshra.s32 %s1280_s10, 3 }
  0xee   : >> { %v581_v55 = vld [vmem:[%s580_s12] sm:$0xff]  ;;  %v582_v59 = vld [vmem:[%s580_s12 + $0x8] sm:$0xff]  ;;  %s928_s20 = sshll.u32 %s711_s19, 2 }
  0xef   : >> { %s714_s21 = scalar_lea.vmem %s1217_s11, %s928_s20 }
  0xf0   : >> { %971 = vmatmul.mubr.msk.bf16.vlgmr.msra.gmra.mxu0 %vm342_vm0, %v583_v54 }
 0x15b   : >> { %v660_v17 = vpop.permute.xlu1 %659 }
 0x15f   : >> { %v662_v19 = vpop.permute.xlu1 %661 }
 0x1b0   : >> { %v634_v56 = vpop.f32.mrf.mxu0 }
 0x1b1   : >> { %v641_v57 = vadd.f32 %v634_v56, %v581_v55 }
 0x1b2   : >> { %v972_v58 = vpop.f32.mrf.mxu0 }
 0x1b3   : >> { %1055 = vtanh.f32 %v641_v57  ;;  %v924_v1 = vmul.f32 -1.442695, %v641_v57 }
 0x1b4   : >> { %v637_v60 = vpop.f32.mrf.mxu0 }
 0x1b5   : >> { %v642_v61 = vadd.f32 %v637_v60, %v582_v59 }
 0x1b6   : >> { %v973_v62 = vpop.f32.mrf.mxu0 }
 0x1b7   : >> { %1057 = vtanh.f32 %v642_v61  ;;  %v925_v2 = vmul.f32 -1.442695, %v642_v61 }
 0x1b8   : >> { %1059 = vpow2.f32 %v924_v1 }
 0x1b9   : >> { %1061 = vpow2.f32 %v925_v2 }
 0x1c0   : >> { %v1056_v63 = vpop.eup %1055 }
 0x1c1   : >> { %669 = vrot.lane.b32.xlu0 %v1056_v63, %s1139_s13 }
 0x1c4   : >> { %v1058_v0 = vpop.eup %1057 }
 0x1c5   : >> { %671 = vrot.lane.b32.xlu0 %v1058_v0, %s1139_s13  ;;  %v1060_v3 = vpop.eup %1059 }
 0x1c6   : >> { %v649_v4 = vadd.f32 1.0, %v1060_v3  ;;  %v1062_v7 = vpop.eup %1061 }
 0x1c7   : >> { %v650_v10 = vadd.f32 1.0, %v1062_v7 }
 0x1c8   : >> { %1063 = vrcp.f32 %v649_v4 }
 0x1c9   : >> { %1065 = vrcp.f32 %v650_v10 }
 0x1d5   : >> { %v1064_v11 = vpop.eup %1063 }
 0x1d6   : >> { %v1066_v14 = vpop.eup %1065  ;;  %v665_v18 = vmul.f32 %v1064_v11, %v660_v17 }
 0x1d7   : >> { %v666_v22 = vmul.f32 %v1066_v14, %v662_v19 }
 0x233   : >> { %v670_v12 = vpop.permute.xlu0 %669 }
 0x234   : >> { %v675_v13 = vmul.f32 %v1064_v11, %v670_v12 }
 0x236   : >> { %679 = vrot.lane.b32.xlu0 %v675_v13, %s1138_s30 }
 0x237   : >> { %v672_v15 = vpop.permute.xlu0 %671 }
 0x238   : >> { %v676_v16 = vmul.f32 %v1066_v14, %v672_v15 }
 0x23a   : >> { %681 = vrot.lane.b32.xlu1 %v676_v16, %s1138_s30 }
 0x2a8   : >> { %v680_v20 = vpop.permute.xlu0 %679 }
 0x2a9   : >> { %v685_v21 = vadd.f32 %v680_v20, %v665_v18 }
 0x2ab   : >> { %1067 = vtanh.f32 %v685_v21 }
 0x2ac   : >> { %v682_v23 = vpop.permute.xlu1 %681 }
 0x2ad   : >> { %v686_v24 = vadd.f32 %v682_v23, %v666_v22 }
 0x2af   : >> { %1069 = vtanh.f32 %v686_v24 }
 0x2b8   : >> { %v1068_v25 = vpop.eup %1067 }
 0x2b9   : >> { %691 = vrot.lane.b32.xlu0 %v1068_v25, %s1139_s13 }
 0x2bc   : >> { %v1070_v26 = vpop.eup %1069 }
 0x2bd   : >> { %693 = vrot.lane.b32.xlu1 %v1070_v26, %s1139_s13 }
 0x32b   : >> { %v692_v27 = vpop.permute.xlu0 %691 }
 0x32c   : >> { %v697_v28 = vmul.f32 %v1064_v11, %v692_v27 }
 0x32e   : >> { %720 = vrot.lane.b32.xlu0 %v697_v28, %s1138_s30  ;;  %v934_v30 = vpack.c.bf16 %v697_v28, %v697_v28 }
 0x32f   : >> { %v694_v29 = vpop.permute.xlu1 %693 }
 0x330   : >> { %v698_v31 = vmul.f32 %v1066_v14, %v694_v29 }
 0x332   : >> { %705 = vrot.lane.b32.xlu0 %v934_v30, %s1138_s30  ;;  %722 = vrot.lane.b32.xlu1 %v698_v31, %s1138_s30  ;;  %v935_v32 = vpack.c.bf16 %v698_v31, %v698_v31 }
 0x336   : >> { %728 = vrot.lane.b32.xlu0 %v685_v21, %s1140_s14  ;;  %707 = vrot.lane.b32.xlu1 %v935_v32, %s1138_s30 }
 0x33a   : >> { %730 = vrot.lane.b32.xlu1 %v686_v24, %s1140_s14 }
 0x3a0   : >> { %v721_v33 = vpop.permute.xlu0 %720  }
 0x3a1   : >> { %v1327_v14 = vmov %v721_v33  ;;  %735 = vst.msk [vmem:[#allocation2] sm:$0xff] (%p566_p5), %vm342_vm0, %v721_v33 }
 0x3a4   : >> { %v706_v34 = vpop.permute.xlu0 %705  ;;  %v723_v35 = vpop.permute.xlu1 %722  }
 0x3a5   : >> { %716 = vst.msk [vmem:[%s714_s21] sm:$0xf] %vm715_vm3, %v706_v34  ;;  %v1326_v15 = vmov %v723_v35 }
 0x3a6   : > { %736 = vst.msk [vmem:[#allocation2 + $0x8] sm:$0xff] (%p566_p5), %vm342_vm0, %v723_v35 }
 0x3a8   : >> { %v729_v36 = vpop.permute.xlu0 %728   ;;  %v708_v37 = vpop.permute.xlu1 %707 }
 0x3a9   : >> { %717 = vst.msk [vmem:[%s714_s21 + $0x4] sm:$0xf] %vm715_vm3, %v708_v37  ;;  %v1325_v16 = vmov %v729_v36  ;;  %568 = sbr.rel (!%p566_p5) target bundleno = 231 (0xe7), region = 88 }
 0x3aa   : > { %737 = vst.msk [vmem:[#allocation3] sm:$0xff] (%p566_p5), %vm342_vm0, %v729_v36 }
 0x3ac   : >> { %v731_v38 = vpop.permute.xlu1 %730  }
 0x3ad   : >> { %v1324_v17 = vmov %v731_v38  ;;  %738 = vst.msk [vmem:[#allocation3 + $0x8] sm:$0xff] (%p566_p5), %vm342_vm0, %v731_v38 }
 0x3ae PF: > { %s14_s17 = sadd.s32 1, %s1113_s17   ;;  %s1328_s15 = smov %s1109_s16 }
 0x3af   : > { %p11_p6 = scmp.ge.s32.totalorder %s14_s17, 4   ;;  %s1329_s16 = smov %s1331_s18 }
 0x3b1   :  { %13 = sbr.rel (!%p11_p6) target bundleno = 2 (0x2), region = 99 }

// kernel: lstm_classifier_forward.3
= control target key start
LH: loop header
LB: loop body
LE: loop exit
PB: predicated region body
PF: predicated region fallthrough
CT: control target
= control target key end

     0   :  { %vm28_vm0 = vcmask 261120   ;;  %v1426_v1 = vmov 0.0   ;;  %s1732_s1 = inlined_call_operand.vmem [shape: bf16[2,2,32,128], index: 1, kind: input, shape index: {}]   ;;  %s1733_s4 = inlined_call_operand.vmem [shape: f32[2,32,2], index: 4, kind: input, shape index: {}]   ;;  %s1734_s5 = inlined_call_operand.vmem [shape: f32[1,2], index: 5, kind: input, shape index: {}]   ;;  %s1735_s6 = inlined_call_operand.vmem [shape: f32[16,2], index: 6, kind: output, shape index: {}]   ;;  %s1736_s0 = inlined_call_operand.vmem [shape: bf16[2,128,32], index: 0, kind: input, shape index: {}]   ;;  %s1737_s2 = inlined_call_operand.vmem [shape: bf16[2,32,128], index: 2, kind: input, shape index: {}]   ;;  %s1738_s3 = inlined_call_operand.vmem [shape: f32[2,1,128], index: 3, kind: input, shape index: {}]  }
   0x1   :  { %v1312_v0 = vld [vmem:[%s1732_s1 + $0x18] sm:$0xff]   ;;  %29 = vst.msk [vmem:[#allocation2] sm:$0xff] %vm28_vm0, %v1426_v1  ;;  %30 = vst.msk [vmem:[#allocation2 + $0x8] sm:$0xff] %vm28_vm0, %v1426_v1  ;;  %v1313_v2 = vld [vmem:[%s1732_s1 + $0x8] sm:$0xff]  }
   0x2   :  { %31 = vst.msk [vmem:[#allocation3] sm:$0xff] %vm28_vm0, %v1426_v1  ;;  %32 = vst.msk [vmem:[#allocation3 + $0x8] sm:$0xff] %vm28_vm0, %v1426_v1  ;;  %1176 = vmatprep.subr.bf16.mxu0 %v1312_v0  ;;  %v1314_v3 = vld [vmem:[%s1732_s1 + $0x10] sm:$0xff]   ;;  %1196 = vmatprep.subr.bf16.mxu1 %v1313_v2  ;;  %v1315_v4 = vld [vmem:[%s1732_s1] sm:$0xff]  }
   0x3   :  { %1177 = vmatpush3.bf16.msra.mxu0 %v1312_v0  ;;  %1197 = vmatpush3.bf16.msra.mxu1 %v1313_v2  ;;  %v1316_v5 = vld [vmem:[%s1736_s0 + $0x40] sm:$0xff]   ;;  %v1318_v7 = vld [vmem:[%s1736_s0 + $0x48] sm:$0xff]   ;;  %v1320_v13 = vld [vmem:[%s1736_s0 + $0x50] sm:$0xff]  }
   0x4   :  { %1178 = vmatprep.subr.bf16.mxu0 %v1314_v3  ;;  %1198 = vmatprep.subr.bf16.mxu1 %v1315_v4  ;;  %v1317_v6 = vld [vmem:[%s1736_s0] sm:$0xff]   ;;  %v1319_v12 = vld [vmem:[%s1736_s0 + $0x8] sm:$0xff]   ;;  %v1321_v14 = vld [vmem:[%s1736_s0 + $0x10] sm:$0xff]  }
   0x5   :  { %1180 = vmatprep.mubr.msk.bf16.mxu0 %vm28_vm0, %v1316_v5  ;;  %1200 = vmatprep.mubr.msk.bf16.mxu1 %vm28_vm0, %v1317_v6  ;;  %v1322_v15 = vld [vmem:[%s1736_s0 + $0x58] sm:$0xff]   ;;  %v1324_v17 = vld [vmem:[%s1736_s0 + $0x60] sm:$0xff]   ;;  %v1326_v19 = vld [vmem:[%s1736_s0 + $0x68] sm:$0xff]  }
   0x6   :  { %v1323_v16 = vld [vmem:[%s1736_s0 + $0x18] sm:$0xff]   ;;  %v1325_v18 = vld [vmem:[%s1736_s0 + $0x20] sm:$0xff]   ;;  %v1327_v20 = vld [vmem:[%s1736_s0 + $0x28] sm:$0xff]  }
   0x7   :  { %1179 = vmatpush3.bf16.msra.mxu0 %v1314_v3  ;;  %1199 = vmatpush3.bf16.msra.mxu1 %v1315_v4  ;;  %v1328_v21 = vld [vmem:[%s1736_s0 + $0x70] sm:$0xff]   ;;  %v1330_v23 = vld [vmem:[%s1736_s0 + $0x78] sm:$0xff]   ;;  %v1566_v25 = vld [vmem:[%s1737_s2] sm:$0xf] }
   0x8   :  { %v1501_v8 = vld [vmem:[#allocation2] sm:$0xff]   ;;  %v1503_v9 = vld [vmem:[#allocation2 + $0x8] sm:$0xff]   ;;  %v1329_v22 = vld [vmem:[%s1736_s0 + $0x30] sm:$0xff]  }
   0x9   :  { %v1505_v10 = vld [vmem:[#allocation3] sm:$0xff]   ;;  %v1508_v11 = vld [vmem:[#allocation3 + $0x8] sm:$0xff]   ;;  %v1571_v26 = vld [vmem:[%s1737_s2 + $0x4] sm:$0xf] }
   0xa   :  { %1181 = vmatmul.mubr.msk.bf16.vlgmr.msra.gmra.mxu0 %vm28_vm0, %v1318_v7  ;;  %1201 = vmatmul.mubr.msk.bf16.vlgmr.msra.gmra.mxu1 %vm28_vm0, %v1319_v12  ;;  %v1331_v24 = vld [vmem:[%s1736_s0 + $0x38] sm:$0xff]   ;;  %v1576_v27 = vld [vmem:[%s1737_s2 + $0x8] sm:$0xf]  ;;  %v1581_v28 = vld [vmem:[%s1737_s2 + $0xc] sm:$0xf]  ;;  %s1616_s2 = smov 0  }
   0xb   :  { %1184 = vmatprep.mubr.msk.bf16.mxu0 %vm28_vm0, %v1320_v13  ;;  %1204 = vmatprep.mubr.msk.bf16.mxu1 %vm28_vm0, %v1321_v14  ;;  %v1586_v31 = vld [vmem:[%s1738_s3] ss:$0 sm:$0xff] }
  0x12   :  { %1185 = vmatmul.mubr.msk.bf16.gmra.mxu0 %vm28_vm0, %v1322_v15  ;;  %1205 = vmatmul.mubr.msk.bf16.gmra.mxu1 %vm28_vm0, %v1323_v16 }
  0x13   :  { %1188 = vmatprep.mubr.msk.bf16.mxu0 %vm28_vm0, %v1324_v17  ;;  %1208 = vmatprep.mubr.msk.bf16.mxu1 %vm28_vm0, %v1325_v18 }
  0x1a   :  { %1189 = vmatmul.mubr.msk.bf16.gmra.mxu0 %vm28_vm0, %v1326_v19  ;;  %1209 = vmatmul.mubr.msk.bf16.gmra.mxu1 %vm28_vm0, %v1327_v20 }
  0x1b   :  { %1192 = vmatprep.mubr.msk.bf16.mxu0 %vm28_vm0, %v1328_v21  ;;  %1212 = vmatprep.mubr.msk.bf16.mxu1 %vm28_vm0, %v1329_v22 }
  0x22   :  { %1193 = vmatmul.mubr.msk.bf16.gmra.mxu0 %vm28_vm0, %v1330_v23  ;;  %1213 = vmatmul.mubr.msk.bf16.gmra.mxu1 %vm28_vm0, %v1331_v24 }
  0xca   :  { %v1182_v29 = vpop.f32.mrf.mxu0  ;;  %v1202_v30 = vpop.f32.mrf.mxu1 }
  0xcb   :  { %v368_v32 = vadd.f32 %v1202_v30, %v1182_v29 }
  0xcc   :  { %v186_v33 = vpop.f32.mrf.mxu0  ;;  %v359_v34 = vpop.f32.mrf.mxu1 }
  0xcd   :  { %v431_v35 = vadd.f32 %v1586_v31, %v368_v32  ;;  %v360_v36 = vadd.f32 %v359_v34, %v186_v33 }
  0xce   :  { %v1183_v37 = vpop.f32.mrf.mxu0  ;;  %v1203_v38 = vpop.f32.mrf.mxu1 }
  0xcf   :  { %447 = vst [vmem:[#allocation4 + $0x10] sm:$0xff] %v431_v35  ;;  %v429_v39 = vadd.f32 %v1586_v31, %v360_v36  ;;  %v371_v40 = vadd.f32 %v1203_v38, %v1183_v37 }
  0xd0   :  { %v189_v41 = vpop.f32.mrf.mxu0  ;;  %v362_v42 = vpop.f32.mrf.mxu1 }
  0xd1   :  { %445 = vst [vmem:[#allocation4] sm:$0xff] %v429_v39  ;;  %v432_v43 = vadd.f32 %v1586_v31, %v371_v40  ;;  %v363_v44 = vadd.f32 %v362_v42, %v189_v41 }
  0xd2   :  { %v1186_v45 = vpop.f32.mrf.mxu0  ;;  %v1206_v46 = vpop.f32.mrf.mxu1 }
  0xd3   :  { %448 = vst [vmem:[#allocation4 + $0x18] sm:$0xff] %v432_v43  ;;  %v430_v47 = vadd.f32 %v1586_v31, %v363_v44  ;;  %v384_v48 = vadd.f32 %v1206_v46, %v1186_v45 }
  0xd4   :  { %v202_v49 = vpop.f32.mrf.mxu0  ;;  %v375_v50 = vpop.f32.mrf.mxu1 }
  0xd5   :  { %446 = vst [vmem:[#allocation4 + $0x8] sm:$0xff] %v430_v47  ;;  %v435_v51 = vadd.f32 %v1586_v31, %v384_v48  ;;  %v376_v52 = vadd.f32 %v375_v50, %v202_v49 }
  0xd6   :  { %v1187_v53 = vpop.f32.mrf.mxu0  ;;  %v1207_v54 = vpop.f32.mrf.mxu1 }
  0xd7   :  { %451 = vst [vmem:[#allocation4 + $0x30] sm:$0xff] %v435_v51  ;;  %v433_v55 = vadd.f32 %v1586_v31, %v376_v52  ;;  %v387_v56 = vadd.f32 %v1207_v54, %v1187_v53 }
  0xd8   :  { %v205_v57 = vpop.f32.mrf.mxu0  ;;  %v378_v58 = vpop.f32.mrf.mxu1 }
  0xd9   :  { %449 = vst [vmem:[#allocation4 + $0x20] sm:$0xff] %v433_v55  ;;  %v436_v59 = vadd.f32 %v1586_v31, %v387_v56  ;;  %v379_v60 = vadd.f32 %v378_v58, %v205_v57 }
  0xda   :  { %v1190_v61 = vpop.f32.mrf.mxu0  ;;  %v1210_v62 = vpop.f32.mrf.mxu1 }
  0xdb   :  { %452 = vst [vmem:[#allocation4 + $0x38] sm:$0xff] %v436_v59  ;;  %v434_v63 = vadd.f32 %v1586_v31, %v379_v60  ;;  %v400_v0 = vadd.f32 %v1210_v62, %v1190_v61 }
  0xdc   :  { %v218_v2 = vpop.f32.mrf.mxu0  ;;  %v391_v3 = vpop.f32.mrf.mxu1 }
  0xdd   :  { %450 = vst [vmem:[#allocation4 + $0x28] sm:$0xff] %v434_v63  ;;  %v439_v4 = vadd.f32 %v1586_v31, %v400_v0  ;;  %v392_v5 = vadd.f32 %v391_v3, %v218_v2 }
  0xde   :  { %v1191_v6 = vpop.f32.mrf.mxu0  ;;  %v1211_v7 = vpop.f32.mrf.mxu1 }
  0xdf   :  { %455 = vst [vmem:[#allocation4 + $0x50] sm:$0xff] %v439_v4  ;;  %v437_v12 = vadd.f32 %v1586_v31, %v392_v5  ;;  %v403_v13 = vadd.f32 %v1211_v7, %v1191_v6 }
  0xe0   :  { %v221_v14 = vpop.f32.mrf.mxu0  ;;  %v394_v15 = vpop.f32.mrf.mxu1 }
  0xe1   :  { %453 = vst [vmem:[#allocation4 + $0x40] sm:$0xff] %v437_v12  ;;  %v440_v16 = vadd.f32 %v1586_v31, %v403_v13  ;;  %v395_v17 = vadd.f32 %v394_v15, %v221_v14 }
  0xe2   :  { %v1194_v18 = vpop.f32.mrf.mxu0  ;;  %v1214_v19 = vpop.f32.mrf.mxu1 }
  0xe3   :  { %456 = vst [vmem:[#allocation4 + $0x58] sm:$0xff] %v440_v16  ;;  %v438_v20 = vadd.f32 %v1586_v31, %v395_v17  ;;  %v416_v21 = vadd.f32 %v1214_v19, %v1194_v18 }
  0xe4   :  { %v234_v22 = vpop.f32.mrf.mxu0  ;;  %v407_v23 = vpop.f32.mrf.mxu1 }
  0xe5   :  { %454 = vst [vmem:[#allocation4 + $0x48] sm:$0xff] %v438_v20  ;;  %v443_v24 = vadd.f32 %v1586_v31, %v416_v21  ;;  %v408_v29 = vadd.f32 %v407_v23, %v234_v22 }
  0xe6   :  { %v1195_v30 = vpop.f32.mrf.mxu0  ;;  %v1215_v32 = vpop.f32.mrf.mxu1 }
  0xe7   :  { %459 = vst [vmem:[#allocation4 + $0x70] sm:$0xff] %v443_v24  ;;  %v441_v33 = vadd.f32 %v1586_v31, %v408_v29  ;;  %v419_v34 = vadd.f32 %v1215_v32, %v1195_v30 }
  0xe8   :  { %v237_v35 = vpop.f32.mrf.mxu0  ;;  %v410_v36 = vpop.f32.mrf.mxu1 }
  0xe9   :  { %457 = vst [vmem:[#allocation4 + $0x60] sm:$0xff] %v441_v33  ;;  %v444_v37 = vadd.f32 %v1586_v31, %v419_v34  ;;  %v411_v38 = vadd.f32 %v410_v36, %v237_v35 }
  0xeb   :  { %460 = vst [vmem:[#allocation4 + $0x78] sm:$0xff] %v444_v37  ;;  %v442_v39 = vadd.f32 %v1586_v31, %v411_v38 }
  0xed   :  { %458 = vst [vmem:[#allocation4 + $0x68] sm:$0xff] %v442_v39 }
  0xee LB: > { %v1096_v31 = vcombine.low %v1576_v27, %v1581_v28  ;;  %v1427_v40 = vmov 0.0   ;;  %vm1428_vm1 = vmmov 0   ;;  %v1095_v41 = vcombine.low %v1566_v25, %v1571_v26  ;;  %s1429_s23 = smov 32   ;;  %s1094_s24 = sshll.u32 %s1424_s2, 4  ;;  %s1424_s2 = sphi %s1616_s2, %s474_s2   ;;  %v1420_v8 = vphi %v1501_v8, %v1744_v8   ;;  %v1416_v9 = vphi %v1503_v9, %v1743_v9   ;;  %v1412_v10 = vphi %v1505_v10, %v1742_v10   ;;  %v1408_v11 = vphi %v1508_v11, %v1741_v11  }
  0xef   : > { %1216 = vmatprep.subr.bf16.mxu0 %v1427_v40  ;;  %1220 = vmatprep.mubr.msk.bf16.mxu0 %vm1428_vm1, %v1427_v40  ;;  %v483_v42 = vpack.c.bf16 %v1416_v9, %v1420_v8  ;;  %s480_s25 = scalar_lea.vmem [#allocation4], %s1094_s24  ;;  %s1430_s26 = smov 64  }
  0xf0   : > { %1217 = vmatpush3.bf16.msra.mxu0 %v1096_v31  ;;  %558 = vrot.lane.b32.xlu1 %v1412_v10, %s1429_s23  ;;  %s1431_s27 = smov 96   ;;  %s474_s2 = sadd.s32 1, %s1424_s2  }
  0xf1   : > { %1218 = vmatprep.subr.bf16.mxu0 %v1427_v40  ;;  %p471_p0 = scmp.ge.s32.totalorder %s474_s2, 8  }
  0xf2   :  { %1232 = vmatprep.subr.bf16.mxu1 (%p471_p0), %v1426_v1  ;;  %v1348_v20 = vld [vmem:[%s1732_s1 + $0x38] sm:$0xff] (%p471_p0)   ;;  %v1349_v25 = vld [vmem:[%s1732_s1 + $0x28] sm:$0xff] (%p471_p0)   ;;  %vm1432_vm2 = vmmov (%p471_p0), 0   ;;  %v1350_v26 = vld [vmem:[%s1732_s1 + $0x30] sm:$0xff] (%p471_p0)   ;;  %s1435_s8 = smov (%p471_p0), 32   ;;  %vm1011_vm3 = vcmask (%p471_p0), 15360  }
  0xf3   :  { %1236 = vmatprep.mubr.msk.bf16.mxu1 (%p471_p0), %vm1432_vm2, %v1426_v1  ;;  %1233 = vmatpush3.bf16.msra.mxu1 (%p471_p0), %v1349_v25  ;;  %v1351_v27 = vld [vmem:[%s1732_s1 + $0x20] sm:$0xff] (%p471_p0)   ;;  %v1352_v28 = vld [vmem:[%s1736_s0 + $0x78] sm:$0xff] (%p471_p0)  }
  0xf4   : > { %1219 = vmatpush3.bf16.msra.mxu0 %v1095_v41  ;;  %560 = vrot.lane.b32.xlu1 %v1408_v11, %s1429_s23  ;;  %v481_v43 = vld [vmem:[%s480_s25] sm:$0xff]  ;;  %v482_v47 = vld [vmem:[%s480_s25 + $0x8] sm:$0xff]  ;;  %v1353_v21 = vld [vmem:[%s1736_s0 + $0x38] sm:$0xff] (%p471_p0)   ;;  %s1433_s0 = smov (%p471_p0), 64  }
  0xf5   :  { %1224 = vmatprep.subr.bf16.mxu0 (%p471_p0), %v1426_v1  ;;  %1234 = vmatprep.subr.bf16.mxu1 (%p471_p0), %v1426_v1 }
  0xf7   : > { %1221 = vmatmul.mubr.msk.bf16.vlgmr.msra.gmra.mxu0 %vm28_vm0, %v483_v42  ;;  %1235 = vmatpush3.bf16.msra.mxu1 (%p471_p0), %v1351_v27  ;;  %v1134_v27 = vld [vmem:[%s1734_s5] ss:$0 sm:$0xff] (%p471_p0) }
  0xf8   :  { %1228 = vmatprep.mubr.msk.bf16.mxu0 (%p471_p0), %vm1432_vm2, %v1426_v1  ;;  %1225 = vmatpush3.bf16.msra.mxu0 (%p471_p0), %v1348_v20 }
  0xf9   :  { %1226 = vmatprep.subr.bf16.mxu0 (%p471_p0), %v1426_v1  ;;  %v1119_v1 = vld [vmem:[%s1738_s3 + $0x1] ss:$0 sm:$0xff] (%p471_p0)  ;;  %s1434_s3 = smov (%p471_p0), 96  }
  0xfa   :  { %1237 = vmatmul.mubr.msk.bf16.vlgmr.msra.gmra.mxu1 (%p471_p0), %vm28_vm0, %v1353_v21 }
  0xfc   :  { %1227 = vmatpush3.bf16.msra.mxu0 (%p471_p0), %v1350_v26 }
  0xff   :  { %1229 = vmatmul.mubr.msk.bf16.vlgmr.msra.gmra.mxu0 (%p471_p0), %vm28_vm0, %v1352_v28 }
 0x162   : > { %v559_v61 = vpop.permute.xlu1 %558 }
 0x166   : > { %v561_v63 = vpop.permute.xlu1 %560 }
 0x1b7   : > { %v533_v44 = vpop.f32.mrf.mxu0 }
 0x1b8   : > { %v540_v45 = vadd.f32 %v533_v44, %v481_v43 }
 0x1b9   : > { %v1222_v46 = vpop.f32.mrf.mxu0 }
 0x1ba   : > { %1332 = vtanh.f32 %v540_v45  ;;  %v1098_v9 = vmul.f32 -1.442695, %v540_v45  ;;  %v750_v23 = vpop.f32.mrf.mxu1 (%p471_p0) }
 0x1bb   : > { %v536_v48 = vpop.f32.mrf.mxu0 }
 0x1bc   : > { %v541_v49 = vadd.f32 %v536_v48, %v482_v47  ;;  %v1238_v30 = vpop.f32.mrf.mxu1 (%p471_p0) }
 0x1bd   : > { %v1223_v50 = vpop.f32.mrf.mxu0 }
 0x1be   : > { %1334 = vtanh.f32 %v541_v49  ;;  %v1099_v10 = vmul.f32 -1.442695, %v541_v49  ;;  %v753_v34 = vpop.f32.mrf.mxu1 (%p471_p0) }
 0x1bf   : > { %1336 = vpow2.f32 %v1098_v9  ;;  %v689_v22 = vpop.f32.mrf.mxu0 (%p471_p0) }
 0x1c0   : > { %1338 = vpow2.f32 %v1099_v10  ;;  %v751_v24 = vadd.f32 (%p471_p0), %v750_v23, %v689_v22  ;;  %v1239_v37 = vpop.f32.mrf.mxu1 (%p471_p0) }
 0x1c1   :  { %v1230_v29 = vpop.f32.mrf.mxu0 (%p471_p0) }
 0x1c2   :  { %v765_v32 = vadd.f32 (%p471_p0), %v1119_v1, %v751_v24 }
 0x1c3   :  { %v692_v33 = vpop.f32.mrf.mxu0 (%p471_p0) }
 0x1c4   :  { %v754_v35 = vadd.f32 (%p471_p0), %v753_v34, %v692_v33  ;;  %v1120_v40 = vmul.f32 (%p471_p0), -1.442695, %v765_v32 }
 0x1c5   :  { %v1231_v36 = vpop.f32.mrf.mxu0 (%p471_p0) }
 0x1c6   :  { %v766_v38 = vadd.f32 (%p471_p0), %v1119_v1, %v754_v35 }
 0x1c7   : > { %v1333_v51 = vpop.eup %1332 }
 0x1c8   : > { %568 = vrot.lane.b32.xlu0 %v1333_v51, %s1430_s26  ;;  %v1121_v41 = vmul.f32 (%p471_p0), -1.442695, %v766_v38 }
 0x1cb   : > { %v1335_v8 = vpop.eup %1334 }
 0x1cc   : > { %570 = vrot.lane.b32.xlu0 %v1335_v8, %s1430_s26  ;;  %v1337_v11 = vpop.eup %1336 }
 0x1cd   : > { %v548_v52 = vadd.f32 1.0, %v1337_v11  ;;  %v1339_v53 = vpop.eup %1338 }
 0x1ce   : > { %v549_v54 = vadd.f32 1.0, %v1339_v53  ;;  %v1128_v53 = vld [vmem:[%s1733_s4 + $0x30] sm:$0xff] (%p471_p0) }
 0x1cf   : > { %1340 = vrcp.f32 %v548_v52  ;;  %v829_v52 = vld [vmem:[%s1733_s4 + $0x10] sm:$0xff] (%p471_p0) }
 0x1d0   : > { %1342 = vrcp.f32 %v549_v54  ;;  %v828_v54 = vld [vmem:[%s1733_s4 + $0x8] sm:$0xff] (%p471_p0) }
 0x1dc   : > { %v1341_v55 = vpop.eup %1340 }
 0x1dd   : > { %v1343_v58 = vpop.eup %1342  ;;  %v564_v62 = vmul.f32 %v1341_v55, %v559_v61 }
 0x1de   : > { %v565_v3 = vmul.f32 %v1343_v58, %v561_v63 }
 0x23a   : > { %v569_v56 = vpop.permute.xlu0 %568 }
 0x23b   : > { %v574_v57 = vmul.f32 %v1341_v55, %v569_v56 }
 0x23d   : > { %578 = vrot.lane.b32.xlu0 %v574_v57, %s1429_s23 }
 0x23e   : > { %v571_v59 = vpop.permute.xlu0 %570 }
 0x23f   : > { %v575_v60 = vmul.f32 %v1343_v58, %v571_v59 }
 0x241   : > { %580 = vrot.lane.b32.xlu1 %v575_v60, %s1429_s23 }
 0x2af   : > { %v579_v0 = vpop.permute.xlu0 %578 }
 0x2b0   : > { %v584_v2 = vadd.f32 %v579_v0, %v564_v62 }
 0x2b2   : > { %1344 = vtanh.f32 %v584_v2 }
 0x2b3   : > { %v581_v4 = vpop.permute.xlu1 %580 }
 0x2b4   : > { %v585_v5 = vadd.f32 %v581_v4, %v565_v3 }
 0x2b6   : > { %1346 = vtanh.f32 %v585_v5 }
 0x2b7   :  { %1354 = vtanh.f32 (%p471_p0), %v765_v32 }
 0x2b8   :  { %1356 = vtanh.f32 (%p471_p0), %v766_v38 }
 0x2b9   :  { %1358 = vpow2.f32 (%p471_p0), %v1120_v40 }
 0x2ba   :  { %1360 = vpow2.f32 (%p471_p0), %v1121_v41 }
 0x2bf   : > { %v1345_v6 = vpop.eup %1344 }
 0x2c0   : > { %590 = vrot.lane.b32.xlu0 %v1345_v6, %s1430_s26 }
 0x2c3   : > { %v1347_v7 = vpop.eup %1346 }
 0x2c4   : > { %592 = vrot.lane.b32.xlu1 %v1347_v7, %s1430_s26  ;;  %v1355_v39 = vpop.eup (%p471_p0), %1354  ;;  %v827_v7 = vld [vmem:[%s1733_s4] sm:$0xff] (%p471_p0) }
 0x2c5   :  { %v1357_v31 = vpop.eup (%p471_p0), %1356 }
 0x2c6   :  { %v1359_v42 = vpop.eup (%p471_p0), %1358 }
 0x2c7   :  { %v773_v43 = vadd.f32 (%p471_p0), 1.0, %v1359_v42  ;;  %v1361_v44 = vpop.eup (%p471_p0), %1360 }
 0x2c8   :  { %v774_v45 = vadd.f32 (%p471_p0), 1.0, %v1361_v44 }
 0x2c9   :  { %1362 = vrcp.f32 (%p471_p0), %v773_v43 }
 0x2ca   :  { %1364 = vrcp.f32 (%p471_p0), %v774_v45 }
 0x2d6   :  { %v1363_v46 = vpop.eup (%p471_p0), %1362 }
 0x2d7   :  { %v1365_v49 = vpop.eup (%p471_p0), %1364 }
 0x332   : > { %v591_v12 = vpop.permute.xlu0 %590 }
 0x333   : > { %v596_v13 = vmul.f32 %v1341_v55, %v591_v12  ;;  %v1127_v55 = vld [vmem:[%s1733_s4 + $0x28] sm:$0xff] (%p471_p0) }
 0x335   : > { %600 = vrot.lane.b32.xlu0 %v596_v13, %s1429_s23  ;;  %v1126_v13 = vld [vmem:[%s1733_s4 + $0x20] sm:$0xff] (%p471_p0) }
 0x336   : > { %v593_v14 = vpop.permute.xlu1 %592 }
 0x337   : > { %v597_v15 = vmul.f32 %v1343_v58, %v593_v14 }
 0x339   : > { %608 = vrot.lane.b32.xlu0 %v584_v2, %s1431_s27  ;;  %602 = vrot.lane.b32.xlu1 %v597_v15, %s1429_s23 }
 0x33d   : > { %610 = vrot.lane.b32.xlu1 %v585_v5, %s1431_s27  ;;  %783 = vrot.lane.b32.xlu0 (%p471_p0), %v1355_v39, %s1433_s0 }
 0x341   :  { %785 = vrot.lane.b32.xlu0 (%p471_p0), %v1357_v31, %s1433_s0 }
 0x3a7   : > { %v1641_v8 = vpop.permute.xlu0 %600  }
 0x3a8   : > { %v1739_v16 = vmov %v1641_v8 }
 0x3a9   : > { %v1744_v8 = vmov %v1739_v16  ;;  %614 = vst.msk [vmem:[#allocation2] sm:$0xff] (%p471_p0), %vm28_vm0, %v1739_v16  ;;  %v1122_v56 = vmul.f32 (%p471_p0), -1.442695, %v1739_v16 }
 0x3ab   : > { %v609_v17 = vpop.permute.xlu0 %608   ;;  %v1643_v9 = vpop.permute.xlu1 %602  }
 0x3ac   : > { %v1740_v18 = vmov %v1643_v9  ;;  %v1742_v10 = vmov %v609_v17  ;;  %473 = sbr.rel (!%p471_p0) target bundleno = 238 (0xee), region = 66  ;;  %616 = vst.msk [vmem:[#allocation3] sm:$0xff] (%p471_p0), %vm28_vm0, %v609_v17 }
 0x3ad   : > { %v1743_v9 = vmov %v1740_v18  ;;  %615 = vst.msk [vmem:[#allocation2 + $0x8] sm:$0xff] (%p471_p0), %vm28_vm0, %v1740_v18  ;;  %v830_v10 = vld [vmem:[%s1733_s4 + $0x18] sm:$0xff] (%p471_p0)  ;;  %v1123_v57 = vmul.f32 (%p471_p0), -1.442695, %v1740_v18 }
 0x3ae   :  { %1251 = vmatprep.subr.mxu1 (%p471_p0), %v830_v10 }
 0x3af   : > { %v611_v19 = vpop.permute.xlu1 %610   ;;  %v784_v47 = vpop.permute.xlu0 (%p471_p0), %783  ;;  %1252 = vmatpush3.msra.mxu1 (%p471_p0), %v830_v10 }
 0x3b0   : > { %v1741_v11 = vmov %v611_v19  ;;  %617 = vst.msk [vmem:[#allocation3 + $0x8] sm:$0xff] (%p471_p0), %vm28_vm0, %v611_v19  ;;  %v789_v48 = vmul.f32 (%p471_p0), %v1363_v46, %v784_v47  ;;  %1253 = vmatprep.subr.mxu1 (%p471_p0), %v829_v52 }
 0x3b1   :  { %v1129_v11 = vld [vmem:[%s1733_s4 + $0x38] sm:$0xff]  ;;  %1254 = vmatpush3.msra.mxu1 %v829_v52 }
 0x3b2   :  { %1366 = vtanh.f32 %v789_v48  ;;  %1240 = vmatprep.subr.mxu0 %v1129_v11  ;;  %1255 = vmatprep.subr.mxu1 %v828_v54 }
 0x3b3   :  { %v786_v50 = vpop.permute.xlu0 %785  ;;  %1241 = vmatpush3.msra.mxu0 %v1129_v11  ;;  %1256 = vmatpush3.msra.mxu1 %v828_v54 }
 0x3b4   :  { %v790_v51 = vmul.f32 %v1365_v49, %v786_v50  ;;  %1242 = vmatprep.subr.mxu0 %v1128_v53  ;;  %1257 = vmatprep.subr.mxu1 %v827_v7 }
 0x3b5   :  { %1243 = vmatpush3.msra.mxu0 %v1128_v53  ;;  %1258 = vmatpush3.msra.mxu1 %v827_v7 }
 0x3b6   :  { %1368 = vtanh.f32 %v790_v51  ;;  %1244 = vmatprep.subr.mxu0 %v1127_v55 }
 0x3b7   :  { %1245 = vmatpush3.msra.mxu0 %v1127_v55  ;;  %1370 = vpow2.f32 %v1122_v56 }
 0x3b8   :  { %1372 = vpow2.f32 %v1123_v57  ;;  %1246 = vmatprep.subr.mxu0 %v1126_v13 }
 0x3b9   :  { %1247 = vmatpush3.msra.mxu0 %v1126_v13 }
 0x3bf   :  { %v1367_v8 = vpop.eup %1366 }
 0x3c0   :  { %795 = vrot.lane.b32.xlu1 %v1367_v8, %s1434_s3 }
 0x3c3   :  { %v1369_v9 = vpop.eup %1368 }
 0x3c4   :  { %797 = vrot.lane.b32.xlu1 %v1369_v9, %s1434_s3  ;;  %v1371_v63 = vpop.eup %1370 }
 0x3c5   :  { %v1373_v0 = vpop.eup %1372  ;;  %v809_v3 = vadd.f32 1.0, %v1371_v63 }
 0x3c6   :  { %v810_v4 = vadd.f32 1.0, %v1373_v0 }
 0x432   :  { %v796_v58 = vpop.permute.xlu1 %795 }
 0x433   :  { %v801_v59 = vmul.f32 %v1363_v46, %v796_v58 }
 0x435   :  { %v1124_v60 = vmul.f32 -1.442695, %v801_v59 }
 0x436   :  { %v798_v61 = vpop.permute.xlu1 %797 }
 0x437   :  { %1374 = vpow2.f32 %v1124_v60  ;;  %v802_v62 = vmul.f32 %v1365_v49, %v798_v61 }
 0x439   :  { %v1125_v2 = vmul.f32 -1.442695, %v802_v62 }
 0x43b   :  { %1376 = vpow2.f32 %v1125_v2 }
 0x43c   :  { %1378 = vrcp.f32 %v809_v3 }
 0x43d   :  { %1380 = vrcp.f32 %v810_v4 }
 0x444   :  { %v1375_v5 = vpop.eup %1374 }
 0x445   :  { %v821_v6 = vadd.f32 1.0, %v1375_v5 }
 0x447   :  { %1382 = vrcp.f32 %v821_v6 }
 0x448   :  { %v1377_v12 = vpop.eup %1376 }
 0x449   :  { %v1379_v14 = vpop.eup %1378  ;;  %v822_v15 = vadd.f32 1.0, %v1377_v12 }
 0x44a   :  { %v1381_v16 = vpop.eup %1380  ;;  %1259 = vmatprep.mubr.msk.f32.mxu1 %vm28_vm0, %v1379_v14 }
 0x44b   :  { %1384 = vrcp.f32 %v822_v15  ;;  %1260 = vmatmul.mubr.msk.f32.vlgmr.msra.gmra.mxu1 %vm28_vm0, %v1381_v16 }
 0x454   :  { %v1383_v17 = vpop.eup %1382 }
 0x455   :  { %838 = vrot.lane.b32.xlu0 %v1383_v17, %s1435_s8 }
 0x458   :  { %v1385_v18 = vpop.eup %1384 }
 0x459   :  { %840 = vrot.lane.b32.xlu1 %v1385_v18, %s1435_s8 }
 0x4c7   :  { %v839_v19 = vpop.permute.xlu0 %838 }
 0x4c8   :  { %1248 = vmatprep.mubr.msk.f32.mxu0 %vm28_vm0, %v839_v19 }
 0x4cb   :  { %v841_v20 = vpop.permute.xlu1 %840 }
 0x4cc   :  { %1249 = vmatmul.mubr.msk.f32.vlgmr.msra.gmra.mxu0 %vm28_vm0, %v841_v20 }
 0x50b   :  { %v1261_v25 = vpop.f32.mrf.mxu1 }
 0x50d   :  { %v993_v21 = vpop.f32.mrf.mxu1 }
 0x58c   :  { %v1250_v26 = vpop.f32.mrf.mxu0 }
 0x58d   :  { %v999_v28 = vadd.f32 %v1261_v25, %v1250_v26 }
 0x58e   :  { %v912_v22 = vpop.f32.mrf.mxu0 }
 0x58f   :  { %v1010_v23 = vadd.f32 %v1134_v27, %v999_v28  ;;  %v994_v1 = vadd.f32 %v993_v21, %v912_v22 }
 0x591   :  { %1013 = vst.msk [vmem:[%s1735_s6 + $0x8] sm:$0xff] %vm1011_vm3, %v1010_v23  ;;  %v1009_v24 = vadd.f32 %v1134_v27, %v994_v1 }
 0x593   :  { %1012 = vst.msk [vmem:[%s1735_s6] sm:$0xff] %vm1011_vm3, %v1009_v24 }

</bundles_post_ra>
